<compile_context>
chip_gen: v5e
topology: v5e:2x2
jax: 0.10.0
libtpu: 0.0.40
codegen_flags: <defaults>
</compile_context>

<pallas_src>
import functools

import jax
import jax.numpy as jnp
from jax.experimental import pallas as pl
from jax.experimental.pallas import tpu as pltpu

LEAKY_SLOPE = 0.2
BN_EPS = 1e-5


def _round_up(x, m):
    return (x + m - 1) // m * m


def _cdiv(a, b):
    return (a + b - 1) // b


# ---------------------------------------------------------------------------
# Pallas kernel: one big matmul per grid step (+ bias / LeakyReLU / BN stats)
# ---------------------------------------------------------------------------
def _conv_mm_kernel(*refs, has_bias, activation, emit_stats):
    """refs (in order):
         x_ref   [tm, K]          bf16   tap-merged im2col rows
         w_ref   [K, Cout_pad]    bf16   reshaped conv weights (zero-padded cols)
        (b_ref   [1, Cout_pad]    f32)   only if has_bias
         o_ref   [tm, Cout_pad]   bf16   conv (+bias/act) output
        (sum_ref, sq_ref [1,1,Cout_pad] f32)  only if emit_stats
    """
    idx = 0
    x_ref = refs[idx]; idx += 1
    w_ref = refs[idx]; idx += 1
    b_ref = None
    if has_bias:
        b_ref = refs[idx]; idx += 1
    o_ref = refs[idx]; idx += 1
    sum_ref = sq_ref = None
    if emit_stats:
        sum_ref, sq_ref = refs[idx], refs[idx + 1]

    # Single MXU contraction: [tm, K] @ [K, Cout_pad] -> f32 [tm, Cout_pad].
    acc = jnp.dot(x_ref[...], w_ref[...], preferred_element_type=jnp.float32)

    if emit_stats:
        # Rows coming from zero-padded inputs are exactly zero (no bias on BN
        # layers), so they contribute nothing to the statistics.
        cpad = acc.shape[-1]
        sum_ref[...] = jnp.sum(acc, axis=0).reshape(1, 1, cpad)
        sq_ref[...] = jnp.sum(acc * acc, axis=0).reshape(1, 1, cpad)

    if has_bias:
        acc = acc + b_ref[...]
    if activation == "leaky":
        acc = jnp.where(acc > 0, acc, LEAKY_SLOPE * acc)

    o_ref[...] = acc.astype(o_ref.dtype)


# ---------------------------------------------------------------------------
# Row-tile sizing: M >= 256 where possible, grid >= 2, VMEM-friendly blocks
# ---------------------------------------------------------------------------
def _pick_row_tile(m_rows, k_dim):
    cap = max(8, ((1 << 20) // (2 * k_dim)) // 8 * 8)      # ~1 MiB bf16 input block
    two_step = _round_up(max(_cdiv(m_rows, 2), 8), 8)      # keep >= 2 grid steps
    return max(8, min(512, cap, two_step))


# ---------------------------------------------------------------------------
# Wrapper: tap-merged packing (XLA layout fusion) + Pallas matmul kernel
# ---------------------------------------------------------------------------
def conv4x4s2(x_nhwc, w_hwio, bias=None, *, pad, activation="none",
              emit_stats=False):
    """4x4 stride-2 conv (+ optional bias / LeakyReLU / BN stats) via Pallas."""
    N, H, W, Cin = x_nhwc.shape
    kh, kw, wcin, Cout = w_hwio.shape
    assert (kh, kw) == (4, 4) and wcin == Cin
    assert (H + 2 * pad - 4) % 2 == 0 and (W + 2 * pad - 4) % 2 == 0
    ho = (H + 2 * pad - 4) // 2 + 1
    wo = (W + 2 * pad - 4) // 2 + 1
    K = 16 * Cin
    cout_pad = _round_up(Cout, 128)                         # lane-dense output

    # Tap-merged im2col: 16 shifted stride-2 views concatenated along channels.
    # One XLA layout fusion; ~4x bf16 re-read of a small activation.
    xb = x_nhwc.astype(jnp.bfloat16)
    if pad:
        xb = jnp.pad(xb, ((0, 0), (pad, pad), (pad, pad), (0, 0)))
    taps = [xb[:, di:di + 2 * ho - 1:2, dj:dj + 2 * wo - 1:2, :]
            for di in range(4) for dj in range(4)]
    cols = jnp.concatenate(taps, axis=-1).reshape(N * ho * wo, K)

    m_rows = N * ho * wo
    tm = _pick_row_tile(m_rows, K)
    m_pad = _cdiv(m_rows, tm) * tm
    if m_pad != m_rows:
        cols = jnp.pad(cols, ((0, m_pad - m_rows), (0, 0)))

    # Weight: [di, dj, ci, co] -> [(di*4+dj)*Cin + ci, co], zero-pad columns.
    w_mat = w_hwio.reshape(K, Cout).astype(jnp.bfloat16)
    if cout_pad != Cout:
        w_mat = jnp.pad(w_mat, ((0, 0), (0, cout_pad - Cout)))

    grid = (m_pad // tm,)
    in_specs = [pl.BlockSpec((tm, K), lambda i: (i, 0)),
                pl.BlockSpec((K, cout_pad), lambda i: (0, 0))]
    args = [cols, w_mat]
    if bias is not None:
        bvec = jnp.pad(bias.astype(jnp.float32),
                       (0, cout_pad - Cout)).reshape(1, cout_pad)
        in_specs.append(pl.BlockSpec((1, cout_pad), lambda i: (0, 0)))
        args.append(bvec)

    out_shapes = [jax.ShapeDtypeStruct((m_pad, cout_pad), jnp.bfloat16)]
    out_specs = [pl.BlockSpec((tm, cout_pad), lambda i: (i, 0))]
    if emit_stats:
        out_shapes += [jax.ShapeDtypeStruct((grid[0], 1, cout_pad),
                                            jnp.float32)] * 2
        out_specs += [pl.BlockSpec((1, 1, cout_pad), lambda i: (i, 0, 0))] * 2

    kernel = functools.partial(_conv_mm_kernel, has_bias=bias is not None,
                               activation=activation, emit_stats=emit_stats)
    outs = pl.pallas_call(
        kernel,
        out_shape=out_shapes,
        grid=grid,
        in_specs=in_specs,
        out_specs=out_specs,
        compiler_params=pltpu.CompilerParams(
            dimension_semantics=("parallel",)),
    )(*args)

    y = outs[0][:m_rows, :Cout].reshape(N, ho, wo, Cout)
    if emit_stats:
        ssum = jnp.sum(outs[1][:, 0, :Cout], axis=0)
        ssq = jnp.sum(outs[2][:, 0, :Cout], axis=0)
        return y, ssum, ssq
    return y, None, None


def batchnorm_leaky(y, ssum, ssq, gamma, beta):
    """Training-mode BN (batch stats from the kernel side outputs) + LeakyReLU.

    Per-channel affine + leaky; intended to fuse into the next layer's
    tap-merged pack.  Kept outside the kernel because zero-padding of the next
    conv must happen *after* this nonlinearity.
    """
    n, h, w, _ = y.shape
    cnt = float(n * h * w)
    mean = ssum / cnt
    var = jnp.maximum(ssq / cnt - mean * mean, 0.0)   # biased var (BN training)
    scale = gamma * jax.lax.rsqrt(var + BN_EPS)
    shift = beta - mean * scale
    z = y.astype(jnp.float32) * scale + shift
    return jnp.where(z > 0, z, LEAKY_SLOPE * z)


def final_conv_sigmoid(y_nhwc, w_hwio, bias):
    """Last 4x4/stride-2/pad-0 conv + sigmoid as a plain XLA matmul.

    Output is 1x1 spatial with a single channel; a Pallas call here is pure
    dispatch/DMA overhead (per perf review).
    """
    N, H, W, C = y_nhwc.shape
    ho = (H - 4) // 2 + 1
    wo = (W - 4) // 2 + 1
    taps = [y_nhwc[:, di:di + 2 * ho - 1:2, dj:dj + 2 * wo - 1:2, :]
            for di in range(4) for dj in range(4)]
    cols = jnp.concatenate(taps, axis=-1).reshape(N * ho * wo, 16 * C)
    logits = cols.astype(jnp.float32) @ w_hwio.reshape(16 * C, 1).astype(
        jnp.float32) + bias.astype(jnp.float32)
    return jax.nn.sigmoid(logits).reshape(N, ho, wo, 1)


# ---------------------------------------------------------------------------
# Discriminator: params + forward
# ---------------------------------------------------------------------------
def init_params(key, img_channels, features_d):
    fd = features_d
    keys = jax.random.split(key, 7)

    def conv_w(k, cin, cout):
        return 0.05 * jax.random.normal(k, (4, 4, cin, cout), jnp.float32)

    return {
        "c0_w": conv_w(keys[0], img_channels, fd),
        "c0_b": 0.05 * jax.random.normal(keys[1], (fd,), jnp.float32),
        "c1_w": conv_w(keys[2], fd, fd * 2),            # bias=False in blocks
        "bn1_g": jnp.ones((fd * 2,), jnp.float32),
        "bn1_b": jnp.zeros((fd * 2,), jnp.float32),
        "c2_w": conv_w(keys[3], fd * 2, fd * 4),
        "bn2_g": jnp.ones((fd * 4,), jnp.float32),
        "bn2_b": jnp.zeros((fd * 4,), jnp.float32),
        "c3_w": conv_w(keys[4], fd * 4, fd * 8),
        "bn3_g": jnp.ones((fd * 8,), jnp.float32),
        "bn3_b": jnp.zeros((fd * 8,), jnp.float32),
        "c4_w": conv_w(keys[5], fd * 8, 1),
        "c4_b": 0.05 * jax.random.normal(keys[6], (1,), jnp.float32),
    }


def discriminator_forward(params, x_nchw):
    x = jnp.transpose(x_nchw, (0, 2, 3, 1)).astype(jnp.float32)   # NCHW->NHWC

    # Conv(img_ch -> fd, 4, 2, 1) + bias + LeakyReLU (fused in kernel)
    y, _, _ = conv4x4s2(x, params["c0_w"], params["c0_b"], pad=1,
                        activation="leaky")
    # Blocks: Conv(no bias) with fused BN-stats, then per-channel BN+LeakyReLU
    for i in (1, 2, 3):
        y, ssum, ssq = conv4x4s2(y, params[f"c{i}_w"], None, pad=1,
                                 activation="none", emit_stats=True)
        y = batchnorm_leaky(y, ssum, ssq,
                            params[f"bn{i}_g"], params[f"bn{i}_b"])
    # Conv(8fd -> 1, 4, 2, 0) + bias + Sigmoid (plain XLA, tiny)
    y = final_conv_sigmoid(y, params["c4_w"], params["c4_b"])

    return jnp.transpose(y, (0, 3, 1, 2))                         # (N,1,1,1)


if __name__ == "__main__":
    key = jax.random.PRNGKey(0)
    k_param, k_x = jax.random.split(key)

    # DCGAN-style discriminator requires 64x64 inputs (64->32->16->8->4->1).
    img_channels, features_d = 3, 4
    params = init_params(k_param, img_channels, features_d)
    x = jax.random.normal(k_x, (2, img_channels, 64, 64), jnp.float32)

    fwd = jax.jit(discriminator_forward)
    out = jax.block_until_ready(fwd(params, x))

    assert out.shape == (2, 1, 1, 1), out.shape
    assert bool(jnp.all((out >= 0.0) & (out <= 1.0)))
    print("KERNEL_OK")
</pallas_src>

<mosaic_0001>
module attributes {stable_mosaic.version = 11 : i64} {
  func.func @_conv_mm_kernel(%arg0: i32, %arg1: memref<512x48xbf16, #tpu.memory_space<vmem>>, %arg2: memref<48x128xbf16, #tpu.memory_space<vmem>>, %arg3: memref<1x128xf32, #tpu.memory_space<vmem>>, %arg4: memref<512x128xbf16, #tpu.memory_space<vmem>>) attributes {dimension_semantics = [#tpu.dimension_semantics<parallel>], iteration_bounds = array<i64: 4>, scalar_prefetch = 0 : i64, scratch_operands = 0 : i64, tpu.core_type = #tpu.core_type<tc>, window_params = [{transform_indices = @transform_0, window_bounds = array<i64: 512, 48>}, {pipeline_mode = #tpu.pipeline_mode<synchronous>, transform_indices = @transform_1, window_bounds = array<i64: 48, 128>}, {pipeline_mode = #tpu.pipeline_mode<synchronous>, transform_indices = @transform_2, window_bounds = array<i64: 1, 128>}, {transform_indices = @transform_3, window_bounds = array<i64: 512, 128>}]} {
    %c0 = arith.constant 0 : index
    %c0_0 = arith.constant 0 : index
    %0 = vector.load %arg1[%c0, %c0_0] : memref<512x48xbf16, #tpu.memory_space<vmem>>, vector<512x48xbf16>
    %c0_1 = arith.constant 0 : index
    %c0_2 = arith.constant 0 : index
    %1 = vector.load %arg2[%c0_1, %c0_2] : memref<48x128xbf16, #tpu.memory_space<vmem>>, vector<48x128xbf16>
    %cst = arith.constant dense<0.000000e+00> : vector<512x128xf32>
    %2 = tpu.matmul %0, %1, %cst {dimension_numbers = #tpu.dot_dimension_numbers<[1], [0], [0], [1], [0, 0, 1, 1], [], []>} : vector<512x48xbf16>, vector<48x128xbf16>, vector<512x128xf32> -> vector<512x128xf32>
    %c0_3 = arith.constant 0 : index
    %c0_4 = arith.constant 0 : index
    %3 = vector.load %arg3[%c0_3, %c0_4] : memref<1x128xf32, #tpu.memory_space<vmem>>, vector<1x128xf32>
    %4 = vector.broadcast %3 : vector<1x128xf32> to vector<512x128xf32>
    %5 = arith.addf %2, %4 : vector<512x128xf32>
    %cst_5 = arith.constant 0.000000e+00 : f32
    %6 = vector.broadcast %cst_5 : f32 to vector<512x128xf32>
    %7 = arith.cmpf ogt, %5, %6 : vector<512x128xf32>
    %cst_6 = arith.constant 2.000000e-01 : f32
    %8 = vector.broadcast %cst_6 : f32 to vector<512x128xf32>
    %9 = arith.mulf %8, %5 : vector<512x128xf32>
    %10 = arith.select %7, %5, %9 : vector<512x128xi1>, vector<512x128xf32>
    %11 = arith.truncf %10 : vector<512x128xf32> to vector<512x128xbf16>
    %c0_7 = arith.constant 0 : index
    %c0_8 = arith.constant 0 : index
    %12 = vector.load %arg4[%c0_7, %c0_8] : memref<512x128xbf16, #tpu.memory_space<vmem>>, vector<512x128xbf16>
    tpu.vector_store %arg4[%c0_7, %c0_8], %11 {strides = array<i32>} : memref<512x128xbf16, #tpu.memory_space<vmem>>, vector<512x128xbf16>,
    return
  }
  func.func @transform_0(%arg0: i32) -> (i32, i32) {
    %c0_i32 = arith.constant 0 : i32
    %c0_i32_0 = arith.constant 0 : i32
    return %arg0, %c0_i32 : i32, i32
  }
  func.func @transform_1(%arg0: i32) -> (i32, i32) {
    %c0_i32 = arith.constant 0 : i32
    %c0_i32_0 = arith.constant 0 : i32
    %c0_i32_1 = arith.constant 0 : i32
    return %c0_i32, %c0_i32_0 : i32, i32
  }
  func.func @transform_2(%arg0: i32) -> (i32, i32) {
    %c0_i32 = arith.constant 0 : i32
    %c0_i32_0 = arith.constant 0 : i32
    %c0_i32_1 = arith.constant 0 : i32
    return %c0_i32, %c0_i32_0 : i32, i32
  }
  func.func @transform_3(%arg0: i32) -> (i32, i32) {
    %c0_i32 = arith.constant 0 : i32
    %c0_i32_0 = arith.constant 0 : i32
    return %arg0, %c0_i32 : i32, i32
  }
}

module attributes {stable_mosaic.version = 11 : i64} {
  func.func @_conv_mm_kernel(%arg0: i32, %arg1: memref<256x64xbf16, #tpu.memory_space<vmem>>, %arg2: memref<64x128xbf16, #tpu.memory_space<vmem>>, %arg3: memref<256x128xbf16, #tpu.memory_space<vmem>>, %arg4: memref<1x1x128xf32, #tpu.memory_space<vmem>>, %arg5: memref<1x1x128xf32, #tpu.memory_space<vmem>>) attributes {dimension_semantics = [#tpu.dimension_semantics<parallel>], iteration_bounds = array<i64: 2>, scalar_prefetch = 0 : i64, scratch_operands = 0 : i64, tpu.core_type = #tpu.core_type<tc>, window_params = [{transform_indices = @transform_0, window_bounds = array<i64: 256, 64>}, {pipeline_mode = #tpu.pipeline_mode<synchronous>, transform_indices = @transform_1, window_bounds = array<i64: 64, 128>}, {transform_indices = @transform_2, window_bounds = array<i64: 256, 128>}, {transform_indices = @transform_3, window_bounds = array<i64: 1, 1, 128>}, {transform_indices = @transform_4, window_bounds = array<i64: 1, 1, 128>}]} {
    %c0 = arith.constant 0 : index
    %c0_0 = arith.constant 0 : index
    %0 = vector.load %arg1[%c0, %c0_0] : memref<256x64xbf16, #tpu.memory_space<vmem>>, vector<256x64xbf16>
    %c0_1 = arith.constant 0 : index
    %c0_2 = arith.constant 0 : index
    %1 = vector.load %arg2[%c0_1, %c0_2] : memref<64x128xbf16, #tpu.memory_space<vmem>>, vector<64x128xbf16>
    %cst = arith.constant dense<0.000000e+00> : vector<256x128xf32>
    %2 = tpu.matmul %0, %1, %cst {dimension_numbers = #tpu.dot_dimension_numbers<[1], [0], [0], [1], [0, 0, 1, 1], [], []>} : vector<256x64xbf16>, vector<64x128xbf16>, vector<256x128xf32> -> vector<256x128xf32>
    %cst_3 = arith.constant dense<0.000000e+00> : vector<128xf32>
    %3 = vector.multi_reduction <add>, %2, %cst_3 [0] : vector<256x128xf32> to vector<128xf32>
    %4 = vector.shape_cast %3 : vector<128xf32> to vector<1x1x128xf32>
    %c0_4 = arith.constant 0 : index
    %c0_5 = arith.constant 0 : index
    %c0_6 = arith.constant 0 : index
    %5 = vector.load %arg4[%c0_4, %c0_5, %c0_6] : memref<1x1x128xf32, #tpu.memory_space<vmem>>, vector<1x1x128xf32>
    tpu.vector_store %arg4[%c0_4, %c0_5, %c0_6], %4 {strides = array<i32>} : memref<1x1x128xf32, #tpu.memory_space<vmem>>, vector<1x1x128xf32>,
    %6 = arith.mulf %2, %2 : vector<256x128xf32>
    %cst_7 = arith.constant dense<0.000000e+00> : vector<128xf32>
    %7 = vector.multi_reduction <add>, %6, %cst_7 [0] : vector<256x128xf32> to vector<128xf32>
    %8 = vector.shape_cast %7 : vector<128xf32> to vector<1x1x128xf32>
    %c0_8 = arith.constant 0 : index
    %c0_9 = arith.constant 0 : index
    %c0_10 = arith.constant 0 : index
    %9 = vector.load %arg5[%c0_8, %c0_9, %c0_10] : memref<1x1x128xf32, #tpu.memory_space<vmem>>, vector<1x1x128xf32>
    tpu.vector_store %arg5[%c0_8, %c0_9, %c0_10], %8 {strides = array<i32>} : memref<1x1x128xf32, #tpu.memory_space<vmem>>, vector<1x1x128xf32>,
    %10 = arith.truncf %2 : vector<256x128xf32> to vector<256x128xbf16>
    %c0_11 = arith.constant 0 : index
    %c0_12 = arith.constant 0 : index
    %11 = vector.load %arg3[%c0_11, %c0_12] : memref<256x128xbf16, #tpu.memory_space<vmem>>, vector<256x128xbf16>
    tpu.vector_store %arg3[%c0_11, %c0_12], %10 {strides = array<i32>} : memref<256x128xbf16, #tpu.memory_space<vmem>>, vector<256x128xbf16>,
    return
  }
  func.func @transform_0(%arg0: i32) -> (i32, i32) {
    %c0_i32 = arith.constant 0 : i32
    %c0_i32_0 = arith.constant 0 : i32
    return %arg0, %c0_i32 : i32, i32
  }
  func.func @transform_1(%arg0: i32) -> (i32, i32) {
    %c0_i32 = arith.constant 0 : i32
    %c0_i32_0 = arith.constant 0 : i32
    %c0_i32_1 = arith.constant 0 : i32
    return %c0_i32, %c0_i32_0 : i32, i32
  }
  func.func @transform_2(%arg0: i32) -> (i32, i32) {
    %c0_i32 = arith.constant 0 : i32
    %c0_i32_0 = arith.constant 0 : i32
    return %arg0, %c0_i32 : i32, i32
  }
  func.func @transform_3(%arg0: i32) -> (i32, i32, i32) {
    %c0_i32 = arith.constant 0 : i32
    %c0_i32_0 = arith.constant 0 : i32
    %c0_i32_1 = arith.constant 0 : i32
    return %arg0, %c0_i32, %c0_i32_0 : i32, i32, i32
  }
  func.func @transform_4(%arg0: i32) -> (i32, i32, i32) {
    %c0_i32 = arith.constant 0 : i32
    %c0_i32_0 = arith.constant 0 : i32
    %c0_i32_1 = arith.constant 0 : i32
    return %arg0, %c0_i32, %c0_i32_0 : i32, i32, i32
  }
}

module attributes {stable_mosaic.version = 11 : i64} {
  func.func @_conv_mm_kernel(%arg0: i32, %arg1: memref<64x128xbf16, #tpu.memory_space<vmem>>, %arg2: memref<128x128xbf16, #tpu.memory_space<vmem>>, %arg3: memref<64x128xbf16, #tpu.memory_space<vmem>>, %arg4: memref<1x1x128xf32, #tpu.memory_space<vmem>>, %arg5: memref<1x1x128xf32, #tpu.memory_space<vmem>>) attributes {dimension_semantics = [#tpu.dimension_semantics<parallel>], iteration_bounds = array<i64: 2>, scalar_prefetch = 0 : i64, scratch_operands = 0 : i64, tpu.core_type = #tpu.core_type<tc>, window_params = [{transform_indices = @transform_0, window_bounds = array<i64: 64, 128>}, {pipeline_mode = #tpu.pipeline_mode<synchronous>, transform_indices = @transform_1, window_bounds = array<i64: 128, 128>}, {transform_indices = @transform_2, window_bounds = array<i64: 64, 128>}, {transform_indices = @transform_3, window_bounds = array<i64: 1, 1, 128>}, {transform_indices = @transform_4, window_bounds = array<i64: 1, 1, 128>}]} {
    %c0 = arith.constant 0 : index
    %c0_0 = arith.constant 0 : index
    %0 = vector.load %arg1[%c0, %c0_0] : memref<64x128xbf16, #tpu.memory_space<vmem>>, vector<64x128xbf16>
    %c0_1 = arith.constant 0 : index
    %c0_2 = arith.constant 0 : index
    %1 = vector.load %arg2[%c0_1, %c0_2] : memref<128x128xbf16, #tpu.memory_space<vmem>>, vector<128x128xbf16>
    %cst = arith.constant dense<0.000000e+00> : vector<64x128xf32>
    %2 = tpu.matmul %0, %1, %cst {dimension_numbers = #tpu.dot_dimension_numbers<[1], [0], [0], [1], [0, 0, 1, 1], [], []>} : vector<64x128xbf16>, vector<128x128xbf16>, vector<64x128xf32> -> vector<64x128xf32>
    %cst_3 = arith.constant dense<0.000000e+00> : vector<128xf32>
    %3 = vector.multi_reduction <add>, %2, %cst_3 [0] : vector<64x128xf32> to vector<128xf32>
    %4 = vector.shape_cast %3 : vector<128xf32> to vector<1x1x128xf32>
    %c0_4 = arith.constant 0 : index
    %c0_5 = arith.constant 0 : index
    %c0_6 = arith.constant 0 : index
    %5 = vector.load %arg4[%c0_4, %c0_5, %c0_6] : memref<1x1x128xf32, #tpu.memory_space<vmem>>, vector<1x1x128xf32>
    tpu.vector_store %arg4[%c0_4, %c0_5, %c0_6], %4 {strides = array<i32>} : memref<1x1x128xf32, #tpu.memory_space<vmem>>, vector<1x1x128xf32>,
    %6 = arith.mulf %2, %2 : vector<64x128xf32>
    %cst_7 = arith.constant dense<0.000000e+00> : vector<128xf32>
    %7 = vector.multi_reduction <add>, %6, %cst_7 [0] : vector<64x128xf32> to vector<128xf32>
    %8 = vector.shape_cast %7 : vector<128xf32> to vector<1x1x128xf32>
    %c0_8 = arith.constant 0 : index
    %c0_9 = arith.constant 0 : index
    %c0_10 = arith.constant 0 : index
    %9 = vector.load %arg5[%c0_8, %c0_9, %c0_10] : memref<1x1x128xf32, #tpu.memory_space<vmem>>, vector<1x1x128xf32>
    tpu.vector_store %arg5[%c0_8, %c0_9, %c0_10], %8 {strides = array<i32>} : memref<1x1x128xf32, #tpu.memory_space<vmem>>, vector<1x1x128xf32>,
    %10 = arith.truncf %2 : vector<64x128xf32> to vector<64x128xbf16>
    %c0_11 = arith.constant 0 : index
    %c0_12 = arith.constant 0 : index
    %11 = vector.load %arg3[%c0_11, %c0_12] : memref<64x128xbf16, #tpu.memory_space<vmem>>, vector<64x128xbf16>
    tpu.vector_store %arg3[%c0_11, %c0_12], %10 {strides = array<i32>} : memref<64x128xbf16, #tpu.memory_space<vmem>>, vector<64x128xbf16>,
    return
  }
  func.func @transform_0(%arg0: i32) -> (i32, i32) {
    %c0_i32 = arith.constant 0 : i32
    %c0_i32_0 = arith.constant 0 : i32
    return %arg0, %c0_i32 : i32, i32
  }
  func.func @transform_1(%arg0: i32) -> (i32, i32) {
    %c0_i32 = arith.constant 0 : i32
    %c0_i32_0 = arith.constant 0 : i32
    %c0_i32_1 = arith.constant 0 : i32
    return %c0_i32, %c0_i32_0 : i32, i32
  }
  func.func @transform_2(%arg0: i32) -> (i32, i32) {
    %c0_i32 = arith.constant 0 : i32
    %c0_i32_0 = arith.constant 0 : i32
    return %arg0, %c0_i32 : i32, i32
  }
  func.func @transform_3(%arg0: i32) -> (i32, i32, i32) {
    %c0_i32 = arith.constant 0 : i32
    %c0_i32_0 = arith.constant 0 : i32
    %c0_i32_1 = arith.constant 0 : i32
    return %arg0, %c0_i32, %c0_i32_0 : i32, i32, i32
  }
  func.func @transform_4(%arg0: i32) -> (i32, i32, i32) {
    %c0_i32 = arith.constant 0 : i32
    %c0_i32_0 = arith.constant 0 : i32
    %c0_i32_1 = arith.constant 0 : i32
    return %arg0, %c0_i32, %c0_i32_0 : i32, i32, i32
  }
}

module attributes {stable_mosaic.version = 11 : i64} {
  func.func @_conv_mm_kernel(%arg0: i32, %arg1: memref<16x256xbf16, #tpu.memory_space<vmem>>, %arg2: memref<256x128xbf16, #tpu.memory_space<vmem>>, %arg3: memref<16x128xbf16, #tpu.memory_space<vmem>>, %arg4: memref<1x1x128xf32, #tpu.memory_space<vmem>>, %arg5: memref<1x1x128xf32, #tpu.memory_space<vmem>>) attributes {dimension_semantics = [#tpu.dimension_semantics<parallel>], iteration_bounds = array<i64: 2>, scalar_prefetch = 0 : i64, scratch_operands = 0 : i64, tpu.core_type = #tpu.core_type<tc>, window_params = [{transform_indices = @transform_0, window_bounds = array<i64: 16, 256>}, {pipeline_mode = #tpu.pipeline_mode<synchronous>, transform_indices = @transform_1, window_bounds = array<i64: 256, 128>}, {transform_indices = @transform_2, window_bounds = array<i64: 16, 128>}, {transform_indices = @transform_3, window_bounds = array<i64: 1, 1, 128>}, {transform_indices = @transform_4, window_bounds = array<i64: 1, 1, 128>}]} {
    %c0 = arith.constant 0 : index
    %c0_0 = arith.constant 0 : index
    %0 = vector.load %arg1[%c0, %c0_0] : memref<16x256xbf16, #tpu.memory_space<vmem>>, vector<16x256xbf16>
    %c0_1 = arith.constant 0 : index
    %c0_2 = arith.constant 0 : index
    %1 = vector.load %arg2[%c0_1, %c0_2] : memref<256x128xbf16, #tpu.memory_space<vmem>>, vector<256x128xbf16>
    %cst = arith.constant dense<0.000000e+00> : vector<16x128xf32>
    %2 = tpu.matmul %0, %1, %cst {dimension_numbers = #tpu.dot_dimension_numbers<[1], [0], [0], [1], [0, 0, 1, 1], [], []>} : vector<16x256xbf16>, vector<256x128xbf16>, vector<16x128xf32> -> vector<16x128xf32>
    %cst_3 = arith.constant dense<0.000000e+00> : vector<128xf32>
    %3 = vector.multi_reduction <add>, %2, %cst_3 [0] : vector<16x128xf32> to vector<128xf32>
    %4 = vector.shape_cast %3 : vector<128xf32> to vector<1x1x128xf32>
    %c0_4 = arith.constant 0 : index
    %c0_5 = arith.constant 0 : index
    %c0_6 = arith.constant 0 : index
    %5 = vector.load %arg4[%c0_4, %c0_5, %c0_6] : memref<1x1x128xf32, #tpu.memory_space<vmem>>, vector<1x1x128xf32>
    tpu.vector_store %arg4[%c0_4, %c0_5, %c0_6], %4 {strides = array<i32>} : memref<1x1x128xf32, #tpu.memory_space<vmem>>, vector<1x1x128xf32>,
    %6 = arith.mulf %2, %2 : vector<16x128xf32>
    %cst_7 = arith.constant dense<0.000000e+00> : vector<128xf32>
    %7 = vector.multi_reduction <add>, %6, %cst_7 [0] : vector<16x128xf32> to vector<128xf32>
    %8 = vector.shape_cast %7 : vector<128xf32> to vector<1x1x128xf32>
    %c0_8 = arith.constant 0 : index
    %c0_9 = arith.constant 0 : index
    %c0_10 = arith.constant 0 : index
    %9 = vector.load %arg5[%c0_8, %c0_9, %c0_10] : memref<1x1x128xf32, #tpu.memory_space<vmem>>, vector<1x1x128xf32>
    tpu.vector_store %arg5[%c0_8, %c0_9, %c0_10], %8 {strides = array<i32>} : memref<1x1x128xf32, #tpu.memory_space<vmem>>, vector<1x1x128xf32>,
    %10 = arith.truncf %2 : vector<16x128xf32> to vector<16x128xbf16>
    %c0_11 = arith.constant 0 : index
    %c0_12 = arith.constant 0 : index
    %11 = vector.load %arg3[%c0_11, %c0_12] : memref<16x128xbf16, #tpu.memory_space<vmem>>, vector<16x128xbf16>
    tpu.vector_store %arg3[%c0_11, %c0_12], %10 {strides = array<i32>} : memref<16x128xbf16, #tpu.memory_space<vmem>>, vector<16x128xbf16>,
    return
  }
  func.func @transform_0(%arg0: i32) -> (i32, i32) {
    %c0_i32 = arith.constant 0 : i32
    %c0_i32_0 = arith.constant 0 : i32
    return %arg0, %c0_i32 : i32, i32
  }
  func.func @transform_1(%arg0: i32) -> (i32, i32) {
    %c0_i32 = arith.constant 0 : i32
    %c0_i32_0 = arith.constant 0 : i32
    %c0_i32_1 = arith.constant 0 : i32
    return %c0_i32, %c0_i32_0 : i32, i32
  }
  func.func @transform_2(%arg0: i32) -> (i32, i32) {
    %c0_i32 = arith.constant 0 : i32
    %c0_i32_0 = arith.constant 0 : i32
    return %arg0, %c0_i32 : i32, i32
  }
  func.func @transform_3(%arg0: i32) -> (i32, i32, i32) {
    %c0_i32 = arith.constant 0 : i32
    %c0_i32_0 = arith.constant 0 : i32
    %c0_i32_1 = arith.constant 0 : i32
    return %arg0, %c0_i32, %c0_i32_0 : i32, i32, i32
  }
  func.func @transform_4(%arg0: i32) -> (i32, i32, i32) {
    %c0_i32 = arith.constant 0 : i32
    %c0_i32_0 = arith.constant 0 : i32
    %c0_i32_1 = arith.constant 0 : i32
    return %arg0, %c0_i32, %c0_i32_0 : i32, i32, i32
  }
}

</mosaic_0001>

<bundles_post_ra>
// kernel: discriminator_forward.4
= control target key start
LH: loop header
LB: loop body
LE: loop exit
PB: predicated region body
PF: predicated region fallthrough
CT: control target
= control target key end

     0   :  { %s1524_s12 = smov 0   ;;  %s1726_s0 = inlined_call_operand.vmem [shape: bf16[2048,48], index: 0, kind: input, shape index: {}]   ;;  %s1727_s1 = inlined_call_operand.vmem [shape: bf16[48,128], index: 1, kind: input, shape index: {}]   ;;  %s1728_s2 = inlined_call_operand.vmem [shape: f32[1,128], index: 2, kind: input, shape index: {}]   ;;  %s1729_s3 = inlined_call_operand.vmem [shape: bf16[2048,128], index: 3, kind: output, shape index: {}]  }
   0x1 LB: > { %s1069_s13 = sadd.s32 4294967295, %s1502_s12   ;;  %p1073_p0 = scmp.ge.s32.totalorder %s1502_s12, 1  ;;  %s1502_s12 = sphi %s1524_s12, %s13_s12  }
   0x2   : > { %p138_p1 = scmp.lt.s32.totalorder %s1502_s12, 5 }
   0x4   : > { %p139_p2 = pnand %p1073_p0, %p138_p1 }
   0x5   : > { %s1074_s16 = sshll.u32 (!%p139_p2), %s1069_s13, 6 }
   0x6   : > { %142 = sbr.rel (%p139_p2) target bundleno = 285 (0x11d), region = 32  ;;  %p163_p3 = scmp.lt.s32.totalorder (!%p139_p2), %s1074_s16, 255 }
   0xb   : > { %v1286_v0 = vld [vmem:[%s1727_s1 + $0x10] sm:$0xff]  ;;  %v1285_v1 = vld [vmem:[%s1727_s1 + $0x8] sm:$0xff]  ;;  %s1731_s16 = smov (!%p163_p3, %s1074_s16), 255  ;;  %v1284_v2 = vld [vmem:[%s1727_s1] sm:$0xff]  ;;  %vm427_vm0 = vcmask 392192  }
   0xc   : > { %529 = vmatpush.bf16.msra.mxu0 %v1286_v0  ;;  %1478 = vmatpush.bf16.msra.mxu1 %v1286_v0  ;;  %s1075_s19 = sshll.u32 %s1731_s16, 2  ;;  %v1618_v37 = vld [vmem:[%s1728_s2] ss:$0 sm:$0xff] }
   0xd   : > { %1479 = vmatpush.bf16.msra.mxu2 %v1286_v0  ;;  %1480 = vmatpush.bf16.msra.mxu3 %v1286_v0  ;;  %s1549_s24 = scalar_lea.vmem %s1726_s0, %s1075_s19  ;;  %s1631_s29 = scalar_lea.vmem %s1729_s3, %s1075_s19 }
   0xe   : > { %v1252_v3 = vld [vmem:[%s1549_s24] sm:$0xff]  ;;  %v1253_v7 = vld [vmem:[%s1549_s24 + $0x8] sm:$0xff]  ;;  %v1254_v11 = vld [vmem:[%s1549_s24 + $0x10] sm:$0xff] }
   0xf   : > { %v1260_v4 = vld [vmem:[%s1549_s24 + $0x40] sm:$0xff]  ;;  %v1261_v8 = vld [vmem:[%s1549_s24 + $0x48] sm:$0xff]  ;;  %v1262_v12 = vld [vmem:[%s1549_s24 + $0x50] sm:$0xff] }
  0x10   : > { %530 = vmatpush.bf16.msra.mxu0 %v1285_v1  ;;  %1481 = vmatpush.bf16.msra.mxu1 %v1285_v1  ;;  %v1268_v5 = vld [vmem:[%s1549_s24 + $0x80] sm:$0xff]  ;;  %v1269_v9 = vld [vmem:[%s1549_s24 + $0x88] sm:$0xff]  ;;  %v1270_v13 = vld [vmem:[%s1549_s24 + $0x90] sm:$0xff] }
  0x11   : > { %1482 = vmatpush.bf16.msra.mxu2 %v1285_v1  ;;  %1483 = vmatpush.bf16.msra.mxu3 %v1285_v1  ;;  %v1276_v6 = vld [vmem:[%s1549_s24 + $0xc0] sm:$0xff]  ;;  %v1277_v10 = vld [vmem:[%s1549_s24 + $0xc8] sm:$0xff]  ;;  %v1278_v14 = vld [vmem:[%s1549_s24 + $0xd0] sm:$0xff] }
  0x12   : > { %v1255_v15 = vld [vmem:[%s1549_s24 + $0x18] sm:$0xff]  ;;  %v1256_v19 = vld [vmem:[%s1549_s24 + $0x20] sm:$0xff]  ;;  %v1257_v23 = vld [vmem:[%s1549_s24 + $0x28] sm:$0xff] }
  0x13   : > { %v1263_v16 = vld [vmem:[%s1549_s24 + $0x58] sm:$0xff]  ;;  %v1264_v20 = vld [vmem:[%s1549_s24 + $0x60] sm:$0xff]  ;;  %v1265_v24 = vld [vmem:[%s1549_s24 + $0x68] sm:$0xff] }
  0x14   : > { %531 = vmatpush.bf16.msra.mxu0 %v1284_v2  ;;  %1484 = vmatpush.bf16.msra.mxu1 %v1284_v2  ;;  %v1271_v17 = vld [vmem:[%s1549_s24 + $0x98] sm:$0xff]  ;;  %v1272_v21 = vld [vmem:[%s1549_s24 + $0xa0] sm:$0xff]  ;;  %v1273_v25 = vld [vmem:[%s1549_s24 + $0xa8] sm:$0xff] }
  0x15   : > { %1485 = vmatpush.bf16.msra.mxu2 %v1284_v2  ;;  %1486 = vmatpush.bf16.msra.mxu3 %v1284_v2  ;;  %v1279_v18 = vld [vmem:[%s1549_s24 + $0xd8] sm:$0xff]  ;;  %v1280_v22 = vld [vmem:[%s1549_s24 + $0xe0] sm:$0xff]  ;;  %v1281_v26 = vld [vmem:[%s1549_s24 + $0xe8] sm:$0xff] }
  0x16   : > { %v1258_v27 = vld [vmem:[%s1549_s24 + $0x30] sm:$0xff]  ;;  %v1259_v31 = vld [vmem:[%s1549_s24 + $0x38] sm:$0xff] }
  0x17   : > { %1218 = vmatmul.msk.bf16.vlgmr.msra.gmra.mxu0 %vm427_vm0, %v1252_v3  ;;  %1226 = vmatmul.msk.bf16.vlgmr.msra.gmra.mxu1 %vm427_vm0, %v1260_v4  ;;  %v1266_v28 = vld [vmem:[%s1549_s24 + $0x70] sm:$0xff]  ;;  %v1267_v32 = vld [vmem:[%s1549_s24 + $0x78] sm:$0xff] }
  0x18   : > { %1234 = vmatmul.msk.bf16.vlgmr.msra.gmra.mxu2 %vm427_vm0, %v1268_v5  ;;  %1242 = vmatmul.msk.bf16.vlgmr.msra.gmra.mxu3 %vm427_vm0, %v1276_v6  ;;  %v1274_v29 = vld [vmem:[%s1549_s24 + $0xb0] sm:$0xff]  ;;  %v1275_v33 = vld [vmem:[%s1549_s24 + $0xb8] sm:$0xff] }
  0x19   : > { %v1282_v30 = vld [vmem:[%s1549_s24 + $0xf0] sm:$0xff]  ;;  %v1283_v34 = vld [vmem:[%s1549_s24 + $0xf8] sm:$0xff] }
  0x27   : > { %1219 = vmatmul.msk.bf16.gmra.mxu0 %vm427_vm0, %v1253_v7  ;;  %1227 = vmatmul.msk.bf16.gmra.mxu1 %vm427_vm0, %v1261_v8 }
  0x28   : > { %1235 = vmatmul.msk.bf16.gmra.mxu2 %vm427_vm0, %v1269_v9  ;;  %1243 = vmatmul.msk.bf16.gmra.mxu3 %vm427_vm0, %v1277_v10 }
  0x37   : > { %1220 = vmatmul.msk.bf16.gmra.mxu0 %vm427_vm0, %v1254_v11  ;;  %1228 = vmatmul.msk.bf16.gmra.mxu1 %vm427_vm0, %v1262_v12 }
  0x38   : > { %1236 = vmatmul.msk.bf16.gmra.mxu2 %vm427_vm0, %v1270_v13  ;;  %1244 = vmatmul.msk.bf16.gmra.mxu3 %vm427_vm0, %v1278_v14 }
  0x47   : > { %1221 = vmatmul.msk.bf16.gmra.mxu0 %vm427_vm0, %v1255_v15  ;;  %1229 = vmatmul.msk.bf16.gmra.mxu1 %vm427_vm0, %v1263_v16 }
  0x48   : > { %1237 = vmatmul.msk.bf16.gmra.mxu2 %vm427_vm0, %v1271_v17  ;;  %1245 = vmatmul.msk.bf16.gmra.mxu3 %vm427_vm0, %v1279_v18 }
  0x57   : > { %1222 = vmatmul.msk.bf16.gmra.mxu0 %vm427_vm0, %v1256_v19  ;;  %1230 = vmatmul.msk.bf16.gmra.mxu1 %vm427_vm0, %v1264_v20 }
  0x58   : > { %1238 = vmatmul.msk.bf16.gmra.mxu2 %vm427_vm0, %v1272_v21  ;;  %1246 = vmatmul.msk.bf16.gmra.mxu3 %vm427_vm0, %v1280_v22 }
  0x67   : > { %1223 = vmatmul.msk.bf16.gmra.mxu0 %vm427_vm0, %v1257_v23  ;;  %1231 = vmatmul.msk.bf16.gmra.mxu1 %vm427_vm0, %v1265_v24 }
  0x68   : > { %1239 = vmatmul.msk.bf16.gmra.mxu2 %vm427_vm0, %v1273_v25  ;;  %1247 = vmatmul.msk.bf16.gmra.mxu3 %vm427_vm0, %v1281_v26 }
  0x77   : > { %1224 = vmatmul.msk.bf16.gmra.mxu0 %vm427_vm0, %v1258_v27  ;;  %1232 = vmatmul.msk.bf16.gmra.mxu1 %vm427_vm0, %v1266_v28 }
  0x78   : > { %1240 = vmatmul.msk.bf16.gmra.mxu2 %vm427_vm0, %v1274_v29  ;;  %1248 = vmatmul.msk.bf16.gmra.mxu3 %vm427_vm0, %v1282_v30 }
  0x87   : > { %1225 = vmatmul.msk.bf16.gmra.mxu0 %vm427_vm0, %v1259_v31  ;;  %1233 = vmatmul.msk.bf16.gmra.mxu1 %vm427_vm0, %v1267_v32 }
  0x88   : > { %1241 = vmatmul.msk.bf16.gmra.mxu2 %vm427_vm0, %v1275_v33  ;;  %1249 = vmatmul.msk.bf16.gmra.mxu3 %vm427_vm0, %v1283_v34 }
  0x94   : > { %v533_v35 = vpop.f32.mrf.mxu0  ;;  %v573_v36 = vpop.f32.mrf.mxu1 }
  0x95   : > { %v534_v38 = vadd.f32 %v1618_v37, %v533_v35  ;;  %v574_v39 = vadd.f32 %v1618_v37, %v573_v36 }
  0x97   : > { %v757_v44 = vmul.f32 0.2, %v534_v38  ;;  %v773_v45 = vmul.f32 0.2, %v574_v39  ;;  %vm693_vm1 = vcmp.gt.f32.partialorder %v534_v38, 0.0  ;;  %vm709_vm2 = vcmp.gt.f32.partialorder %v574_v39, 0.0 }
  0x99   : > { %v821_v52 = vsel %vm693_vm1, %v534_v38, %v757_v44  ;;  %v837_v53 = vsel %vm709_vm2, %v574_v39, %v773_v45 }
  0x9b   : > { %v613_v40 = vpop.f32.mrf.mxu2  ;;  %v653_v41 = vpop.f32.mrf.mxu3 }
  0x9c   : > { %v535_v42 = vpop.f32.mrf.mxu0  ;;  %v575_v43 = vpop.f32.mrf.mxu1  ;;  %v614_v50 = vadd.f32 %v1618_v37, %v613_v40  ;;  %v654_v51 = vadd.f32 %v1618_v37, %v653_v41 }
  0x9d   : > { %v536_v46 = vadd.f32 %v1618_v37, %v535_v42  ;;  %v576_v47 = vadd.f32 %v1618_v37, %v575_v43 }
  0x9e   : > { %v789_v60 = vmul.f32 0.2, %v614_v50  ;;  %v805_v61 = vmul.f32 0.2, %v654_v51  ;;  %vm725_vm5 = vcmp.gt.f32.partialorder %v614_v50, 0.0  ;;  %vm741_vm6 = vcmp.gt.f32.partialorder %v654_v51, 0.0 }
  0x9f   : > { %vm694_vm3 = vcmp.gt.f32.partialorder %v536_v46, 0.0  ;;  %v758_v48 = vmul.f32 0.2, %v536_v46  ;;  %vm710_vm4 = vcmp.gt.f32.partialorder %v576_v47, 0.0  ;;  %v774_v49 = vmul.f32 0.2, %v576_v47 }
  0xa0   : > { %v853_v4 = vsel %vm725_vm5, %v614_v50, %v789_v60  ;;  %v869_v5 = vsel %vm741_vm6, %v654_v51, %v805_v61 }
  0xa1   : > { %v822_v54 = vsel %vm694_vm3, %v536_v46, %v758_v48  ;;  %v838_v55 = vsel %vm710_vm4, %v576_v47, %v774_v49 }
  0xa2   : > { %v1290_v56 = vpack.c.bf16 %v822_v54, %v821_v52  ;;  %v1330_v57 = vpack.c.bf16 %v838_v55, %v837_v53 }
  0xa3   : > { %v615_v58 = vpop.f32.mrf.mxu2  ;;  %v655_v59 = vpop.f32.mrf.mxu3 }
  0xa4   : > { %1291 = vst [vmem:[%s1631_s29] sm:$0xff] %v1290_v56   ;;  %v616_v62 = vadd.f32 %v1618_v37, %v615_v58  ;;  %v656_v63 = vadd.f32 %v1618_v37, %v655_v59  ;;  %v538_v0 = vpop.f32.mrf.mxu0  ;;  %v578_v1 = vpop.f32.mrf.mxu1 }
  0xa5   : > { %1454 = vst [vmem:[%s1631_s29 + $0x40] sm:$0xff] %v1330_v57   ;;  %v539_v10 = vadd.f32 %v1618_v37, %v538_v0  ;;  %v579_v11 = vadd.f32 %v1618_v37, %v578_v1 }
  0xa6   : > { %vm726_vm7 = vcmp.gt.f32.partialorder %v616_v62, 0.0  ;;  %v790_v2 = vmul.f32 0.2, %v616_v62  ;;  %vm742_vm8 = vcmp.gt.f32.partialorder %v656_v63, 0.0  ;;  %v806_v3 = vmul.f32 0.2, %v656_v63 }
  0xa7   : > { %v759_v16 = vmul.f32 0.2, %v539_v10  ;;  %v775_v17 = vmul.f32 0.2, %v579_v11  ;;  %vm695_vm9 = vcmp.gt.f32.partialorder %v539_v10, 0.0  ;;  %vm711_vm10 = vcmp.gt.f32.partialorder %v579_v11, 0.0 }
  0xa8   : > { %v854_v6 = vsel %vm726_vm7, %v616_v62, %v790_v2  ;;  %v870_v7 = vsel %vm742_vm8, %v656_v63, %v806_v3 }
  0xa9   : > { %v1370_v8 = vpack.c.bf16 %v854_v6, %v853_v4  ;;  %v1410_v9 = vpack.c.bf16 %v870_v7, %v869_v5  ;;  %v823_v24 = vsel %vm695_vm9, %v539_v10, %v759_v16  ;;  %v839_v25 = vsel %vm711_vm10, %v579_v11, %v775_v17 }
  0xab   : > { %1462 = vst [vmem:[%s1631_s29 + $0x80] sm:$0xff] %v1370_v8   ;;  %v618_v12 = vpop.f32.mrf.mxu2  ;;  %v658_v13 = vpop.f32.mrf.mxu3 }
  0xac   : > { %1470 = vst [vmem:[%s1631_s29 + $0xc0] sm:$0xff] %v1410_v9   ;;  %v540_v14 = vpop.f32.mrf.mxu0  ;;  %v580_v15 = vpop.f32.mrf.mxu1  ;;  %v619_v22 = vadd.f32 %v1618_v37, %v618_v12  ;;  %v659_v23 = vadd.f32 %v1618_v37, %v658_v13 }
  0xad   : > { %v541_v18 = vadd.f32 %v1618_v37, %v540_v14  ;;  %v581_v19 = vadd.f32 %v1618_v37, %v580_v15 }
  0xae   : > { %v791_v32 = vmul.f32 0.2, %v619_v22  ;;  %v807_v33 = vmul.f32 0.2, %v659_v23  ;;  %vm727_vm13 = vcmp.gt.f32.partialorder %v619_v22, 0.0  ;;  %vm743_vm14 = vcmp.gt.f32.partialorder %v659_v23, 0.0 }
  0xaf   : > { %vm696_vm11 = vcmp.gt.f32.partialorder %v541_v18, 0.0  ;;  %v760_v20 = vmul.f32 0.2, %v541_v18  ;;  %vm712_vm12 = vcmp.gt.f32.partialorder %v581_v19, 0.0  ;;  %v776_v21 = vmul.f32 0.2, %v581_v19 }
  0xb0   : > { %v855_v41 = vsel %vm727_vm13, %v619_v22, %v791_v32  ;;  %v871_v42 = vsel %vm743_vm14, %v659_v23, %v807_v33 }
  0xb1   : > { %v824_v26 = vsel %vm696_vm11, %v541_v18, %v760_v20  ;;  %v840_v27 = vsel %vm712_vm12, %v581_v19, %v776_v21 }
  0xb2   : > { %v1295_v28 = vpack.c.bf16 %v824_v26, %v823_v24  ;;  %v1335_v29 = vpack.c.bf16 %v840_v27, %v839_v25 }
  0xb3   : > { %v620_v30 = vpop.f32.mrf.mxu2  ;;  %v660_v31 = vpop.f32.mrf.mxu3 }
  0xb4   : > { %1447 = vst [vmem:[%s1631_s29 + $0x8] sm:$0xff] %v1295_v28   ;;  %v621_v34 = vadd.f32 %v1618_v37, %v620_v30  ;;  %v661_v35 = vadd.f32 %v1618_v37, %v660_v31  ;;  %v543_v36 = vpop.f32.mrf.mxu0  ;;  %v583_v38 = vpop.f32.mrf.mxu1 }
  0xb5   : > { %1455 = vst [vmem:[%s1631_s29 + $0x48] sm:$0xff] %v1335_v29   ;;  %v544_v47 = vadd.f32 %v1618_v37, %v543_v36  ;;  %v584_v48 = vadd.f32 %v1618_v37, %v583_v38 }
  0xb6   : > { %vm728_vm15 = vcmp.gt.f32.partialorder %v621_v34, 0.0  ;;  %v792_v39 = vmul.f32 0.2, %v621_v34  ;;  %vm744_vm0 = vcmp.gt.f32.partialorder %v661_v35, 0.0  ;;  %v808_v40 = vmul.f32 0.2, %v661_v35 }
  0xb7   : > { %v761_v53 = vmul.f32 0.2, %v544_v47  ;;  %v777_v54 = vmul.f32 0.2, %v584_v48  ;;  %vm697_vm1 = vcmp.gt.f32.partialorder %v544_v47, 0.0  ;;  %vm713_vm2 = vcmp.gt.f32.partialorder %v584_v48, 0.0 }
  0xb8   : > { %v856_v43 = vsel %vm728_vm15, %v621_v34, %v792_v39  ;;  %v872_v44 = vsel %vm744_vm0, %v661_v35, %v808_v40 }
  0xb9   : > { %v1375_v45 = vpack.c.bf16 %v856_v43, %v855_v41  ;;  %v1415_v46 = vpack.c.bf16 %v872_v44, %v871_v42  ;;  %v825_v61 = vsel %vm697_vm1, %v544_v47, %v761_v53  ;;  %v841_v62 = vsel %vm713_vm2, %v584_v48, %v777_v54 }
  0xbb   : > { %1463 = vst [vmem:[%s1631_s29 + $0x88] sm:$0xff] %v1375_v45   ;;  %v623_v49 = vpop.f32.mrf.mxu2  ;;  %v663_v50 = vpop.f32.mrf.mxu3 }
  0xbc   : > { %1471 = vst [vmem:[%s1631_s29 + $0xc8] sm:$0xff] %v1415_v46   ;;  %v545_v51 = vpop.f32.mrf.mxu0  ;;  %v585_v52 = vpop.f32.mrf.mxu1  ;;  %v624_v59 = vadd.f32 %v1618_v37, %v623_v49  ;;  %v664_v60 = vadd.f32 %v1618_v37, %v663_v50 }
  0xbd   : > { %v546_v55 = vadd.f32 %v1618_v37, %v545_v51  ;;  %v586_v56 = vadd.f32 %v1618_v37, %v585_v52 }
  0xbe   : > { %v793_v5 = vmul.f32 0.2, %v624_v59  ;;  %v809_v6 = vmul.f32 0.2, %v664_v60  ;;  %vm729_vm5 = vcmp.gt.f32.partialorder %v624_v59, 0.0  ;;  %vm745_vm6 = vcmp.gt.f32.partialorder %v664_v60, 0.0 }
  0xbf   : > { %vm698_vm3 = vcmp.gt.f32.partialorder %v546_v55, 0.0  ;;  %v762_v57 = vmul.f32 0.2, %v546_v55  ;;  %vm714_vm4 = vcmp.gt.f32.partialorder %v586_v56, 0.0  ;;  %v778_v58 = vmul.f32 0.2, %v586_v56 }
  0xc0   : > { %v857_v13 = vsel %vm729_vm5, %v624_v59, %v793_v5  ;;  %v873_v14 = vsel %vm745_vm6, %v664_v60, %v809_v6 }
  0xc1   : > { %v826_v63 = vsel %vm698_vm3, %v546_v55, %v762_v57  ;;  %v842_v0 = vsel %vm714_vm4, %v586_v56, %v778_v58 }
  0xc2   : > { %v1300_v1 = vpack.c.bf16 %v826_v63, %v825_v61  ;;  %v1340_v2 = vpack.c.bf16 %v842_v0, %v841_v62 }
  0xc3   : > { %v625_v3 = vpop.f32.mrf.mxu2  ;;  %v665_v4 = vpop.f32.mrf.mxu3 }
  0xc4   : > { %1448 = vst [vmem:[%s1631_s29 + $0x10] sm:$0xff] %v1300_v1   ;;  %v626_v7 = vadd.f32 %v1618_v37, %v625_v3  ;;  %v666_v8 = vadd.f32 %v1618_v37, %v665_v4  ;;  %v548_v9 = vpop.f32.mrf.mxu0  ;;  %v588_v10 = vpop.f32.mrf.mxu1 }
  0xc5   : > { %1456 = vst [vmem:[%s1631_s29 + $0x50] sm:$0xff] %v1340_v2   ;;  %v549_v19 = vadd.f32 %v1618_v37, %v548_v9  ;;  %v589_v20 = vadd.f32 %v1618_v37, %v588_v10 }
  0xc6   : > { %vm730_vm7 = vcmp.gt.f32.partialorder %v626_v7, 0.0  ;;  %v794_v11 = vmul.f32 0.2, %v626_v7  ;;  %vm746_vm8 = vcmp.gt.f32.partialorder %v666_v8, 0.0  ;;  %v810_v12 = vmul.f32 0.2, %v666_v8 }
  0xc7   : > { %v763_v25 = vmul.f32 0.2, %v549_v19  ;;  %v779_v26 = vmul.f32 0.2, %v589_v20  ;;  %vm699_vm9 = vcmp.gt.f32.partialorder %v549_v19, 0.0  ;;  %vm715_vm10 = vcmp.gt.f32.partialorder %v589_v20, 0.0 }
  0xc8   : > { %v858_v15 = vsel %vm730_vm7, %v626_v7, %v794_v11  ;;  %v874_v16 = vsel %vm746_vm8, %v666_v8, %v810_v12 }
  0xc9   : > { %v1380_v17 = vpack.c.bf16 %v858_v15, %v857_v13  ;;  %v1420_v18 = vpack.c.bf16 %v874_v16, %v873_v14  ;;  %v827_v33 = vsel %vm699_vm9, %v549_v19, %v763_v25  ;;  %v843_v34 = vsel %vm715_vm10, %v589_v20, %v779_v26 }
  0xcb   : > { %1464 = vst [vmem:[%s1631_s29 + $0x90] sm:$0xff] %v1380_v17   ;;  %v628_v21 = vpop.f32.mrf.mxu2  ;;  %v668_v22 = vpop.f32.mrf.mxu3 }
  0xcc   : > { %1472 = vst [vmem:[%s1631_s29 + $0xd0] sm:$0xff] %v1420_v18   ;;  %v550_v23 = vpop.f32.mrf.mxu0  ;;  %v590_v24 = vpop.f32.mrf.mxu1  ;;  %v629_v31 = vadd.f32 %v1618_v37, %v628_v21  ;;  %v669_v32 = vadd.f32 %v1618_v37, %v668_v22 }
  0xcd   : > { %v551_v27 = vadd.f32 %v1618_v37, %v550_v23  ;;  %v591_v28 = vadd.f32 %v1618_v37, %v590_v24 }
  0xce   : > { %v795_v42 = vmul.f32 0.2, %v629_v31  ;;  %v811_v43 = vmul.f32 0.2, %v669_v32  ;;  %vm731_vm13 = vcmp.gt.f32.partialorder %v629_v31, 0.0  ;;  %vm747_vm14 = vcmp.gt.f32.partialorder %v669_v32, 0.0 }
  0xcf   : > { %vm700_vm11 = vcmp.gt.f32.partialorder %v551_v27, 0.0  ;;  %v764_v29 = vmul.f32 0.2, %v551_v27  ;;  %vm716_vm12 = vcmp.gt.f32.partialorder %v591_v28, 0.0  ;;  %v780_v30 = vmul.f32 0.2, %v591_v28 }
  0xd0   : > { %v859_v50 = vsel %vm731_vm13, %v629_v31, %v795_v42  ;;  %v875_v51 = vsel %vm747_vm14, %v669_v32, %v811_v43 }
  0xd1   : > { %v828_v35 = vsel %vm700_vm11, %v551_v27, %v764_v29  ;;  %v844_v36 = vsel %vm716_vm12, %v591_v28, %v780_v30 }
  0xd2   : > { %v1305_v38 = vpack.c.bf16 %v828_v35, %v827_v33  ;;  %v1345_v39 = vpack.c.bf16 %v844_v36, %v843_v34 }
  0xd3   : > { %v630_v40 = vpop.f32.mrf.mxu2  ;;  %v670_v41 = vpop.f32.mrf.mxu3 }
  0xd4   : > { %1449 = vst [vmem:[%s1631_s29 + $0x18] sm:$0xff] %v1305_v38   ;;  %v631_v44 = vadd.f32 %v1618_v37, %v630_v40  ;;  %v671_v45 = vadd.f32 %v1618_v37, %v670_v41  ;;  %v553_v46 = vpop.f32.mrf.mxu0  ;;  %v593_v47 = vpop.f32.mrf.mxu1 }
  0xd5   : > { %1457 = vst [vmem:[%s1631_s29 + $0x58] sm:$0xff] %v1345_v39   ;;  %v554_v56 = vadd.f32 %v1618_v37, %v553_v46  ;;  %v594_v57 = vadd.f32 %v1618_v37, %v593_v47 }
  0xd6   : > { %vm732_vm15 = vcmp.gt.f32.partialorder %v631_v44, 0.0  ;;  %v796_v48 = vmul.f32 0.2, %v631_v44  ;;  %vm748_vm0 = vcmp.gt.f32.partialorder %v671_v45, 0.0  ;;  %v812_v49 = vmul.f32 0.2, %v671_v45 }
  0xd7   : > { %v765_v62 = vmul.f32 0.2, %v554_v56  ;;  %v781_v63 = vmul.f32 0.2, %v594_v57  ;;  %vm701_vm1 = vcmp.gt.f32.partialorder %v554_v56, 0.0  ;;  %vm717_vm2 = vcmp.gt.f32.partialorder %v594_v57, 0.0 }
  0xd8   : > { %v860_v52 = vsel %vm732_vm15, %v631_v44, %v796_v48  ;;  %v876_v53 = vsel %vm748_vm0, %v671_v45, %v812_v49 }
  0xd9   : > { %v1385_v54 = vpack.c.bf16 %v860_v52, %v859_v50  ;;  %v1425_v55 = vpack.c.bf16 %v876_v53, %v875_v51  ;;  %v829_v6 = vsel %vm701_vm1, %v554_v56, %v765_v62  ;;  %v845_v7 = vsel %vm717_vm2, %v594_v57, %v781_v63 }
  0xdb   : > { %1465 = vst [vmem:[%s1631_s29 + $0x98] sm:$0xff] %v1385_v54   ;;  %v633_v58 = vpop.f32.mrf.mxu2  ;;  %v673_v59 = vpop.f32.mrf.mxu3 }
  0xdc   : > { %1473 = vst [vmem:[%s1631_s29 + $0xd8] sm:$0xff] %v1425_v55   ;;  %v555_v60 = vpop.f32.mrf.mxu0  ;;  %v595_v61 = vpop.f32.mrf.mxu1  ;;  %v634_v4 = vadd.f32 %v1618_v37, %v633_v58  ;;  %v674_v5 = vadd.f32 %v1618_v37, %v673_v59 }
  0xdd   : > { %v556_v0 = vadd.f32 %v1618_v37, %v555_v60  ;;  %v596_v1 = vadd.f32 %v1618_v37, %v595_v61 }
  0xde   : > { %v797_v14 = vmul.f32 0.2, %v634_v4  ;;  %v813_v15 = vmul.f32 0.2, %v674_v5  ;;  %vm733_vm5 = vcmp.gt.f32.partialorder %v634_v4, 0.0  ;;  %vm749_vm6 = vcmp.gt.f32.partialorder %v674_v5, 0.0 }
  0xdf   : > { %vm702_vm3 = vcmp.gt.f32.partialorder %v556_v0, 0.0  ;;  %v766_v2 = vmul.f32 0.2, %v556_v0  ;;  %vm718_vm4 = vcmp.gt.f32.partialorder %v596_v1, 0.0  ;;  %v782_v3 = vmul.f32 0.2, %v596_v1 }
  0xe0   : > { %v861_v22 = vsel %vm733_vm5, %v634_v4, %v797_v14  ;;  %v877_v23 = vsel %vm749_vm6, %v674_v5, %v813_v15 }
  0xe1   : > { %v830_v8 = vsel %vm702_vm3, %v556_v0, %v766_v2  ;;  %v846_v9 = vsel %vm718_vm4, %v596_v1, %v782_v3 }
  0xe2   : > { %v1310_v10 = vpack.c.bf16 %v830_v8, %v829_v6  ;;  %v1350_v11 = vpack.c.bf16 %v846_v9, %v845_v7 }
  0xe3   : > { %v635_v12 = vpop.f32.mrf.mxu2  ;;  %v675_v13 = vpop.f32.mrf.mxu3 }
  0xe4   : > { %1450 = vst [vmem:[%s1631_s29 + $0x20] sm:$0xff] %v1310_v10   ;;  %v636_v16 = vadd.f32 %v1618_v37, %v635_v12  ;;  %v676_v17 = vadd.f32 %v1618_v37, %v675_v13  ;;  %v558_v18 = vpop.f32.mrf.mxu0  ;;  %v598_v19 = vpop.f32.mrf.mxu1 }
  0xe5   : > { %1458 = vst [vmem:[%s1631_s29 + $0x60] sm:$0xff] %v1350_v11   ;;  %v559_v28 = vadd.f32 %v1618_v37, %v558_v18  ;;  %v599_v29 = vadd.f32 %v1618_v37, %v598_v19 }
  0xe6   : > { %vm734_vm7 = vcmp.gt.f32.partialorder %v636_v16, 0.0  ;;  %v798_v20 = vmul.f32 0.2, %v636_v16  ;;  %vm750_vm8 = vcmp.gt.f32.partialorder %v676_v17, 0.0  ;;  %v814_v21 = vmul.f32 0.2, %v676_v17 }
  0xe7   : > { %v767_v34 = vmul.f32 0.2, %v559_v28  ;;  %v783_v35 = vmul.f32 0.2, %v599_v29  ;;  %vm703_vm9 = vcmp.gt.f32.partialorder %v559_v28, 0.0  ;;  %vm719_vm10 = vcmp.gt.f32.partialorder %v599_v29, 0.0 }
  0xe8   : > { %v862_v24 = vsel %vm734_vm7, %v636_v16, %v798_v20  ;;  %v878_v25 = vsel %vm750_vm8, %v676_v17, %v814_v21 }
  0xe9   : > { %v1390_v26 = vpack.c.bf16 %v862_v24, %v861_v22  ;;  %v1430_v27 = vpack.c.bf16 %v878_v25, %v877_v23  ;;  %v831_v43 = vsel %vm703_vm9, %v559_v28, %v767_v34  ;;  %v847_v44 = vsel %vm719_vm10, %v599_v29, %v783_v35 }
  0xeb   : > { %1466 = vst [vmem:[%s1631_s29 + $0xa0] sm:$0xff] %v1390_v26   ;;  %v638_v30 = vpop.f32.mrf.mxu2  ;;  %v678_v31 = vpop.f32.mrf.mxu3 }
  0xec   : > { %1474 = vst [vmem:[%s1631_s29 + $0xe0] sm:$0xff] %v1430_v27   ;;  %v560_v32 = vpop.f32.mrf.mxu0  ;;  %v600_v33 = vpop.f32.mrf.mxu1  ;;  %v639_v41 = vadd.f32 %v1618_v37, %v638_v30  ;;  %v679_v42 = vadd.f32 %v1618_v37, %v678_v31 }
  0xed   : > { %v561_v36 = vadd.f32 %v1618_v37, %v560_v32  ;;  %v601_v38 = vadd.f32 %v1618_v37, %v600_v33 }
  0xee   : > { %v799_v51 = vmul.f32 0.2, %v639_v41  ;;  %v815_v52 = vmul.f32 0.2, %v679_v42  ;;  %vm735_vm13 = vcmp.gt.f32.partialorder %v639_v41, 0.0  ;;  %vm751_vm14 = vcmp.gt.f32.partialorder %v679_v42, 0.0 }
  0xef   : > { %vm704_vm11 = vcmp.gt.f32.partialorder %v561_v36, 0.0  ;;  %v768_v39 = vmul.f32 0.2, %v561_v36  ;;  %vm720_vm12 = vcmp.gt.f32.partialorder %v601_v38, 0.0  ;;  %v784_v40 = vmul.f32 0.2, %v601_v38 }
  0xf0   : > { %v863_v59 = vsel %vm735_vm13, %v639_v41, %v799_v51  ;;  %v879_v60 = vsel %vm751_vm14, %v679_v42, %v815_v52 }
  0xf1   : > { %v832_v45 = vsel %vm704_vm11, %v561_v36, %v768_v39  ;;  %v848_v46 = vsel %vm720_vm12, %v601_v38, %v784_v40 }
  0xf2   : > { %v1315_v47 = vpack.c.bf16 %v832_v45, %v831_v43  ;;  %v1355_v48 = vpack.c.bf16 %v848_v46, %v847_v44 }
  0xf3   : > { %v640_v49 = vpop.f32.mrf.mxu2  ;;  %v680_v50 = vpop.f32.mrf.mxu3 }
  0xf4   : > { %1451 = vst [vmem:[%s1631_s29 + $0x28] sm:$0xff] %v1315_v47   ;;  %v641_v53 = vadd.f32 %v1618_v37, %v640_v49  ;;  %v681_v54 = vadd.f32 %v1618_v37, %v680_v50  ;;  %v563_v55 = vpop.f32.mrf.mxu0  ;;  %v603_v56 = vpop.f32.mrf.mxu1 }
  0xf5   : > { %1459 = vst [vmem:[%s1631_s29 + $0x68] sm:$0xff] %v1355_v48   ;;  %v564_v1 = vadd.f32 %v1618_v37, %v563_v55  ;;  %v604_v2 = vadd.f32 %v1618_v37, %v603_v56 }
  0xf6   : > { %vm736_vm15 = vcmp.gt.f32.partialorder %v641_v53, 0.0  ;;  %v800_v57 = vmul.f32 0.2, %v641_v53  ;;  %vm752_vm0 = vcmp.gt.f32.partialorder %v681_v54, 0.0  ;;  %v816_v58 = vmul.f32 0.2, %v681_v54 }
  0xf7   : > { %v769_v7 = vmul.f32 0.2, %v564_v1  ;;  %v785_v8 = vmul.f32 0.2, %v604_v2  ;;  %vm705_vm1 = vcmp.gt.f32.partialorder %v564_v1, 0.0  ;;  %vm721_vm2 = vcmp.gt.f32.partialorder %v604_v2, 0.0 }
  0xf8   : > { %v864_v61 = vsel %vm736_vm15, %v641_v53, %v800_v57  ;;  %v880_v62 = vsel %vm752_vm0, %v681_v54, %v816_v58 }
  0xf9   : > { %v1395_v63 = vpack.c.bf16 %v864_v61, %v863_v59  ;;  %v1435_v0 = vpack.c.bf16 %v880_v62, %v879_v60  ;;  %v833_v15 = vsel %vm705_vm1, %v564_v1, %v769_v7  ;;  %v849_v16 = vsel %vm721_vm2, %v604_v2, %v785_v8 }
  0xfb   : > { %1467 = vst [vmem:[%s1631_s29 + $0xa8] sm:$0xff] %v1395_v63   ;;  %v643_v3 = vpop.f32.mrf.mxu2  ;;  %v683_v4 = vpop.f32.mrf.mxu3 }
  0xfc   : > { %1475 = vst [vmem:[%s1631_s29 + $0xe8] sm:$0xff] %v1435_v0   ;;  %v565_v5 = vpop.f32.mrf.mxu0  ;;  %v605_v6 = vpop.f32.mrf.mxu1  ;;  %v644_v13 = vadd.f32 %v1618_v37, %v643_v3  ;;  %v684_v14 = vadd.f32 %v1618_v37, %v683_v4 }
  0xfd   : > { %v566_v9 = vadd.f32 %v1618_v37, %v565_v5  ;;  %v606_v10 = vadd.f32 %v1618_v37, %v605_v6 }
  0xfe   : > { %v801_v23 = vmul.f32 0.2, %v644_v13  ;;  %v817_v24 = vmul.f32 0.2, %v684_v14  ;;  %vm737_vm5 = vcmp.gt.f32.partialorder %v644_v13, 0.0  ;;  %vm753_vm6 = vcmp.gt.f32.partialorder %v684_v14, 0.0 }
  0xff   : > { %vm706_vm3 = vcmp.gt.f32.partialorder %v566_v9, 0.0  ;;  %v770_v11 = vmul.f32 0.2, %v566_v9  ;;  %vm722_vm4 = vcmp.gt.f32.partialorder %v606_v10, 0.0  ;;  %v786_v12 = vmul.f32 0.2, %v606_v10 }
 0x100   : > { %v865_v31 = vsel %vm737_vm5, %v644_v13, %v801_v23  ;;  %v881_v32 = vsel %vm753_vm6, %v684_v14, %v817_v24 }
 0x101   : > { %v834_v17 = vsel %vm706_vm3, %v566_v9, %v770_v11  ;;  %v850_v18 = vsel %vm722_vm4, %v606_v10, %v786_v12 }
 0x102   : > { %v1320_v19 = vpack.c.bf16 %v834_v17, %v833_v15  ;;  %v1360_v20 = vpack.c.bf16 %v850_v18, %v849_v16 }
 0x103   : > { %v645_v21 = vpop.f32.mrf.mxu2  ;;  %v685_v22 = vpop.f32.mrf.mxu3 }
 0x104   : > { %1452 = vst [vmem:[%s1631_s29 + $0x30] sm:$0xff] %v1320_v19   ;;  %v646_v25 = vadd.f32 %v1618_v37, %v645_v21  ;;  %v686_v26 = vadd.f32 %v1618_v37, %v685_v22  ;;  %v568_v27 = vpop.f32.mrf.mxu0  ;;  %v608_v28 = vpop.f32.mrf.mxu1 }
 0x105   : > { %1460 = vst [vmem:[%s1631_s29 + $0x70] sm:$0xff] %v1360_v20   ;;  %v569_v38 = vadd.f32 %v1618_v37, %v568_v27  ;;  %v609_v39 = vadd.f32 %v1618_v37, %v608_v28 }
 0x106   : > { %vm738_vm7 = vcmp.gt.f32.partialorder %v646_v25, 0.0  ;;  %v802_v29 = vmul.f32 0.2, %v646_v25  ;;  %vm754_vm8 = vcmp.gt.f32.partialorder %v686_v26, 0.0  ;;  %v818_v30 = vmul.f32 0.2, %v686_v26 }
 0x107   : > { %v771_v44 = vmul.f32 0.2, %v569_v38  ;;  %v787_v45 = vmul.f32 0.2, %v609_v39  ;;  %vm707_vm9 = vcmp.gt.f32.partialorder %v569_v38, 0.0  ;;  %vm723_vm10 = vcmp.gt.f32.partialorder %v609_v39, 0.0 }
 0x108   : > { %v866_v33 = vsel %vm738_vm7, %v646_v25, %v802_v29  ;;  %v882_v34 = vsel %vm754_vm8, %v686_v26, %v818_v30 }
 0x109   : > { %v1400_v35 = vpack.c.bf16 %v866_v33, %v865_v31  ;;  %v1440_v36 = vpack.c.bf16 %v882_v34, %v881_v32  ;;  %v835_v52 = vsel %vm707_vm9, %v569_v38, %v771_v44  ;;  %v851_v53 = vsel %vm723_vm10, %v609_v39, %v787_v45 }
 0x10b   : > { %1468 = vst [vmem:[%s1631_s29 + $0xb0] sm:$0xff] %v1400_v35   ;;  %v648_v40 = vpop.f32.mrf.mxu2  ;;  %v688_v41 = vpop.f32.mrf.mxu3 }
 0x10c   : > { %1476 = vst [vmem:[%s1631_s29 + $0xf0] sm:$0xff] %v1440_v36   ;;  %v570_v42 = vpop.f32.mrf.mxu0  ;;  %v610_v43 = vpop.f32.mrf.mxu1  ;;  %v649_v50 = vadd.f32 %v1618_v37, %v648_v40  ;;  %v689_v51 = vadd.f32 %v1618_v37, %v688_v41 }
 0x10d   : > { %v571_v46 = vadd.f32 %v1618_v37, %v570_v42  ;;  %v611_v47 = vadd.f32 %v1618_v37, %v610_v43 }
 0x10e   : > { %v803_v60 = vmul.f32 0.2, %v649_v50  ;;  %v819_v61 = vmul.f32 0.2, %v689_v51  ;;  %vm739_vm13 = vcmp.gt.f32.partialorder %v649_v50, 0.0  ;;  %vm755_vm14 = vcmp.gt.f32.partialorder %v689_v51, 0.0 }
 0x10f   : > { %vm708_vm11 = vcmp.gt.f32.partialorder %v571_v46, 0.0  ;;  %v772_v48 = vmul.f32 0.2, %v571_v46  ;;  %vm724_vm12 = vcmp.gt.f32.partialorder %v611_v47, 0.0  ;;  %v788_v49 = vmul.f32 0.2, %v611_v47 }
 0x110   : > { %v867_v2 = vsel %vm739_vm13, %v649_v50, %v803_v60  ;;  %v883_v3 = vsel %vm755_vm14, %v689_v51, %v819_v61 }
 0x111   : > { %v836_v54 = vsel %vm708_vm11, %v571_v46, %v772_v48  ;;  %v852_v55 = vsel %vm724_vm12, %v611_v47, %v788_v49 }
 0x112   : > { %v1325_v56 = vpack.c.bf16 %v836_v54, %v835_v52  ;;  %v1365_v57 = vpack.c.bf16 %v852_v55, %v851_v53 }
 0x113   : > { %v650_v58 = vpop.f32.mrf.mxu2  ;;  %v690_v59 = vpop.f32.mrf.mxu3 }
 0x114   : > { %1453 = vst [vmem:[%s1631_s29 + $0x38] sm:$0xff] %v1325_v56   ;;  %v651_v62 = vadd.f32 %v1618_v37, %v650_v58  ;;  %v691_v63 = vadd.f32 %v1618_v37, %v690_v59 }
 0x115   : > { %1461 = vst [vmem:[%s1631_s29 + $0x78] sm:$0xff] %v1365_v57  }
 0x116   : > { %vm740_vm15 = vcmp.gt.f32.partialorder %v651_v62, 0.0  ;;  %v804_v0 = vmul.f32 0.2, %v651_v62  ;;  %vm756_vm0 = vcmp.gt.f32.partialorder %v691_v63, 0.0  ;;  %v820_v1 = vmul.f32 0.2, %v691_v63 }
 0x118   : > { %v868_v4 = vsel %vm740_vm15, %v651_v62, %v804_v0  ;;  %v884_v5 = vsel %vm756_vm0, %v691_v63, %v820_v1 }
 0x119   : > { %v1405_v6 = vpack.c.bf16 %v868_v4, %v867_v2  ;;  %v1445_v7 = vpack.c.bf16 %v884_v5, %v883_v3 }
 0x11b   : > { %1469 = vst [vmem:[%s1631_s29 + $0xb8] sm:$0xff] %v1405_v6  }
 0x11c   : > { %1477 = vst [vmem:[%s1631_s29 + $0xf8] sm:$0xff] %v1445_v7  }
 0x11d PF: > { %s13_s12 = sadd.s32 1, %s1502_s12  }
 0x11e   : > { %p10_p4 = scmp.ge.s32.totalorder %s13_s12, 6  }
 0x120   :  { %12 = sbr.rel (!%p10_p4) target bundleno = 1 (0x1), region = 62 }

// kernel: discriminator_forward.5
= control target key start
LH: loop header
LB: loop body
LE: loop exit
PB: predicated region body
PF: predicated region fallthrough
CT: control target
= control target key end

     0   :  { %s1054_s15 = smov 0   ;;  %s1267_s0 = inlined_call_operand.vmem [shape: bf16[512,64], index: 0, kind: input, shape index: {}]   ;;  %s1268_s1 = inlined_call_operand.vmem [shape: bf16[64,128], index: 1, kind: input, shape index: {}]   ;;  %s1269_s2 = inlined_call_operand.vmem [shape: bf16[512,128], index: 2, kind: output, shape index: {0}]   ;;  %s1270_s3 = inlined_call_operand.vmem [shape: f32[2,1,128], index: 3, kind: output, shape index: {1}]   ;;  %s1271_s4 = inlined_call_operand.vmem [shape: f32[2,1,128], index: 4, kind: output, shape index: {2}]  }
   0x1 LB: > { %s1060_s16 = sadd.s32 4294967295, %s1027_s15   ;;  %p783_p0 = scmp.ge.s32.totalorder %s1027_s15, 1  ;;  %s1027_s15 = sphi %s1054_s15, %s15_s15  }
   0x2   : > { %p168_p1 = scmp.lt.s32.totalorder %s1027_s15, 3 }
   0x4   : > { %p169_p2 = pnand %p783_p0, %p168_p1 }
   0x5   : > { %s784_s19 = sshll.u32 (!%p169_p2), %s1060_s16, 5  ;;  %p212_p4 = scmp.lt.s32.totalorder (!%p169_p2), %s1060_s16, 1 }
   0x6   : > { %172 = sbr.rel (%p169_p2) target bundleno = 274 (0x112), region = 28  ;;  %p201_p3 = scmp.lt.s32.totalorder (!%p169_p2), %s784_s19, 63 }
   0xb   : > { %v905_v0 = vld [vmem:[%s1268_s1 + $0x18] sm:$0xff]  ;;  %v904_v1 = vld [vmem:[%s1268_s1 + $0x10] sm:$0xff]  ;;  %s1273_s19 = smov (!%p201_p3, %s784_s19), 63  ;;  %v903_v2 = vld [vmem:[%s1268_s1 + $0x8] sm:$0xff]  ;;  %vm363_vm0 = vcmask 523264   ;;  %s1275_s16 = smov (!%p212_p4, %s1060_s16), 1 }
   0xc   : > { %416 = vmatpush.bf16.msra.mxu0 %v905_v0  ;;  %1001 = vmatpush.bf16.msra.mxu1 %v905_v0  ;;  %s785_s24 = sshll.u32 %s1273_s19, 2  ;;  %v902_v3 = vld [vmem:[%s1268_s1] sm:$0xff]  ;;  %s214_s9 = scalar_lea.vmem %s1270_s3, %s1275_s16 }
   0xd   : > { %1002 = vmatpush.bf16.msra.mxu2 %v905_v0  ;;  %1003 = vmatpush.bf16.msra.mxu3 %v905_v0  ;;  %s1085_s29 = scalar_lea.vmem %s1267_s0, %s785_s24  ;;  %s1128_s6 = scalar_lea.vmem %s1269_s2, %s785_s24 }
   0xe   : > { %v886_v4 = vld [vmem:[%s1085_s29] sm:$0xff]  ;;  %v887_v8 = vld [vmem:[%s1085_s29 + $0x8] sm:$0xff]  ;;  %v888_v12 = vld [vmem:[%s1085_s29 + $0x10] sm:$0xff]  ;;  %s217_s12 = scalar_lea.vmem %s1271_s4, %s1275_s16 }
   0xf   : > { %v890_v5 = vld [vmem:[%s1085_s29 + $0x20] sm:$0xff]  ;;  %v891_v9 = vld [vmem:[%s1085_s29 + $0x28] sm:$0xff]  ;;  %v892_v13 = vld [vmem:[%s1085_s29 + $0x30] sm:$0xff] }
  0x10   : > { %417 = vmatpush.bf16.msra.mxu0 %v904_v1  ;;  %1004 = vmatpush.bf16.msra.mxu1 %v904_v1  ;;  %v894_v6 = vld [vmem:[%s1085_s29 + $0x40] sm:$0xff]  ;;  %v895_v10 = vld [vmem:[%s1085_s29 + $0x48] sm:$0xff]  ;;  %v896_v14 = vld [vmem:[%s1085_s29 + $0x50] sm:$0xff] }
  0x11   : > { %1005 = vmatpush.bf16.msra.mxu2 %v904_v1  ;;  %1006 = vmatpush.bf16.msra.mxu3 %v904_v1  ;;  %v898_v7 = vld [vmem:[%s1085_s29 + $0x60] sm:$0xff]  ;;  %v899_v11 = vld [vmem:[%s1085_s29 + $0x68] sm:$0xff]  ;;  %v900_v15 = vld [vmem:[%s1085_s29 + $0x70] sm:$0xff] }
  0x12   : > { %v889_v16 = vld [vmem:[%s1085_s29 + $0x18] sm:$0xff] }
  0x13   : > { %v893_v17 = vld [vmem:[%s1085_s29 + $0x38] sm:$0xff] }
  0x14   : > { %418 = vmatpush.bf16.msra.mxu0 %v903_v2  ;;  %1007 = vmatpush.bf16.msra.mxu1 %v903_v2  ;;  %v897_v18 = vld [vmem:[%s1085_s29 + $0x58] sm:$0xff] }
  0x15   : > { %1008 = vmatpush.bf16.msra.mxu2 %v903_v2  ;;  %1009 = vmatpush.bf16.msra.mxu3 %v903_v2  ;;  %v901_v19 = vld [vmem:[%s1085_s29 + $0x78] sm:$0xff] }
  0x18   : > { %419 = vmatpush.bf16.msra.mxu0 %v902_v3  ;;  %1010 = vmatpush.bf16.msra.mxu1 %v902_v3 }
  0x19   : > { %1011 = vmatpush.bf16.msra.mxu2 %v902_v3  ;;  %1012 = vmatpush.bf16.msra.mxu3 %v902_v3 }
  0x1b   : > { %868 = vmatmul.msk.bf16.vlgmr.msra.gmra.mxu0 %vm363_vm0, %v886_v4  ;;  %872 = vmatmul.msk.bf16.vlgmr.msra.gmra.mxu1 %vm363_vm0, %v890_v5 }
  0x1c   : > { %876 = vmatmul.msk.bf16.vlgmr.msra.gmra.mxu2 %vm363_vm0, %v894_v6  ;;  %880 = vmatmul.msk.bf16.vlgmr.msra.gmra.mxu3 %vm363_vm0, %v898_v7 }
  0x2b   : > { %869 = vmatmul.msk.bf16.gmra.mxu0 %vm363_vm0, %v887_v8  ;;  %873 = vmatmul.msk.bf16.gmra.mxu1 %vm363_vm0, %v891_v9 }
  0x2c   : > { %877 = vmatmul.msk.bf16.gmra.mxu2 %vm363_vm0, %v895_v10  ;;  %881 = vmatmul.msk.bf16.gmra.mxu3 %vm363_vm0, %v899_v11 }
  0x3b   : > { %870 = vmatmul.msk.bf16.gmra.mxu0 %vm363_vm0, %v888_v12  ;;  %874 = vmatmul.msk.bf16.gmra.mxu1 %vm363_vm0, %v892_v13 }
  0x3c   : > { %878 = vmatmul.msk.bf16.gmra.mxu2 %vm363_vm0, %v896_v14  ;;  %882 = vmatmul.msk.bf16.gmra.mxu3 %vm363_vm0, %v900_v15 }
  0x4b   : > { %871 = vmatmul.msk.bf16.gmra.mxu0 %vm363_vm0, %v889_v16  ;;  %875 = vmatmul.msk.bf16.gmra.mxu1 %vm363_vm0, %v893_v17 }
  0x4c   : > { %879 = vmatmul.msk.bf16.gmra.mxu2 %vm363_vm0, %v897_v18  ;;  %883 = vmatmul.msk.bf16.gmra.mxu3 %vm363_vm0, %v901_v19 }
  0x98   : > { %v421_v20 = vpop.f32.mrf.mxu0  ;;  %v1119_v21 = vpop.f32.mrf.mxu1 }
  0x99   : > { %v539_v53 = vmul.f32 %v421_v20, %v421_v20 }
  0x9f   : > { %v1121_v22 = vpop.f32.mrf.mxu2  ;;  %v1132_v26 = vpop.f32.mrf.mxu3 }
  0xa0   : > { %v423_v23 = vpop.f32.mrf.mxu0  ;;  %v1130_v24 = vpop.f32.mrf.mxu1 }
  0xa1   : > { %v909_v25 = vpack.c.bf16 %v423_v23, %v421_v20  ;;  %v929_v27 = vpack.c.bf16 %v1130_v24, %v1119_v21  ;;  %v540_v52 = vmul.f32 %v423_v23, %v423_v23  ;;  %v501_v54 = vadd.f32 %v423_v23, %v421_v20 }
  0xa2   : > { %v547_v23 = vmul.f32 %v1119_v21, %v1119_v21 }
  0xa3   : > { %910 = vst [vmem:[%s1128_s6] sm:$0xff] %v909_v25   ;;  %v571_v56 = vadd.f32 %v540_v52, %v539_v53 }
  0xa4   : > { %989 = vst [vmem:[%s1128_s6 + $0x20] sm:$0xff] %v929_v27  }
  0xa7   : > { %v1138_v28 = vpop.f32.mrf.mxu2  ;;  %v1144_v32 = vpop.f32.mrf.mxu3 }
  0xa8   : > { %v426_v29 = vpop.f32.mrf.mxu0  ;;  %v1140_v30 = vpop.f32.mrf.mxu1  ;;  %v949_v31 = vpack.c.bf16 %v1138_v28, %v1121_v22  ;;  %v969_v33 = vpack.c.bf16 %v1144_v32, %v1132_v26 }
  0xa9   : > { %v541_v55 = vmul.f32 %v426_v29, %v426_v29  ;;  %v502_v57 = vadd.f32 %v501_v54, %v426_v29 }
  0xaa   : > { %993 = vst [vmem:[%s1128_s6 + $0x40] sm:$0xff] %v949_v31  }
  0xab   : > { %997 = vst [vmem:[%s1128_s6 + $0x60] sm:$0xff] %v969_v33   ;;  %v572_v63 = vadd.f32 %v571_v56, %v541_v55 }
  0xaf   : > { %v1150_v34 = vpop.f32.mrf.mxu2  ;;  %v1154_v38 = vpop.f32.mrf.mxu3 }
  0xb0   : > { %v428_v35 = vpop.f32.mrf.mxu0  ;;  %v1152_v36 = vpop.f32.mrf.mxu1 }
  0xb1   : > { %v914_v37 = vpack.c.bf16 %v428_v35, %v426_v29  ;;  %v934_v39 = vpack.c.bf16 %v1152_v36, %v1140_v30  ;;  %v542_v58 = vmul.f32 %v428_v35, %v428_v35  ;;  %v503_v0 = vadd.f32 %v502_v57, %v428_v35 }
  0xb2   : > { %v548_v29 = vmul.f32 %v1130_v24, %v1130_v24  ;;  %v549_v35 = vmul.f32 %v1140_v30, %v1140_v30 }
  0xb3   : > { %986 = vst [vmem:[%s1128_s6 + $0x8] sm:$0xff] %v914_v37   ;;  %v573_v4 = vadd.f32 %v572_v63, %v542_v58  ;;  %v555_v63 = vmul.f32 %v1121_v22, %v1121_v22 }
  0xb4   : > { %990 = vst [vmem:[%s1128_s6 + $0x28] sm:$0xff] %v934_v39  }
  0xb7   : > { %v1160_v40 = vpop.f32.mrf.mxu2  ;;  %v1166_v44 = vpop.f32.mrf.mxu3 }
  0xb8   : > { %v431_v41 = vpop.f32.mrf.mxu0  ;;  %v1162_v42 = vpop.f32.mrf.mxu1  ;;  %v954_v43 = vpack.c.bf16 %v1160_v40, %v1150_v34  ;;  %v974_v45 = vpack.c.bf16 %v1166_v44, %v1154_v38 }
  0xb9   : > { %v543_v1 = vmul.f32 %v431_v41, %v431_v41  ;;  %v504_v5 = vadd.f32 %v503_v0, %v431_v41 }
  0xba   : > { %994 = vst [vmem:[%s1128_s6 + $0x48] sm:$0xff] %v954_v43  }
  0xbb   : > { %998 = vst [vmem:[%s1128_s6 + $0x68] sm:$0xff] %v974_v45   ;;  %v574_v7 = vadd.f32 %v573_v4, %v543_v1  ;;  %v556_v1 = vmul.f32 %v1138_v28, %v1138_v28 }
  0xbf   : > { %v1172_v46 = vpop.f32.mrf.mxu2  ;;  %v1176_v50 = vpop.f32.mrf.mxu3 }
  0xc0   : > { %v433_v47 = vpop.f32.mrf.mxu0  ;;  %v1174_v48 = vpop.f32.mrf.mxu1 }
  0xc1   : > { %v919_v49 = vpack.c.bf16 %v433_v47, %v431_v41  ;;  %v939_v51 = vpack.c.bf16 %v1174_v48, %v1162_v42  ;;  %v544_v6 = vmul.f32 %v433_v47, %v433_v47  ;;  %v505_v8 = vadd.f32 %v504_v5, %v433_v47 }
  0xc3   : > { %987 = vst [vmem:[%s1128_s6 + $0x10] sm:$0xff] %v919_v49   ;;  %v575_v10 = vadd.f32 %v574_v7, %v544_v6  ;;  %v558_v6 = vmul.f32 %v1160_v40, %v1160_v40 }
  0xc4   : > { %991 = vst [vmem:[%s1128_s6 + $0x30] sm:$0xff] %v939_v51   ;;  %v551_v51 = vmul.f32 %v1162_v42, %v1162_v42 }
  0xc7   : > { %v1182_v59 = vpop.f32.mrf.mxu2  ;;  %v1186_v2 = vpop.f32.mrf.mxu3 }
  0xc8   : > { %v436_v60 = vpop.f32.mrf.mxu0  ;;  %v456_v61 = vpop.f32.mrf.mxu1  ;;  %v959_v62 = vpack.c.bf16 %v1182_v59, %v1172_v46  ;;  %v979_v3 = vpack.c.bf16 %v1186_v2, %v1176_v50 }
  0xc9   : > { %v545_v9 = vmul.f32 %v436_v60, %v436_v60  ;;  %v506_v11 = vadd.f32 %v505_v8, %v436_v60  ;;  %v553_v57 = vmul.f32 %v456_v61, %v456_v61 }
  0xca   : > { %995 = vst [vmem:[%s1128_s6 + $0x50] sm:$0xff] %v959_v62  }
  0xcb   : > { %999 = vst [vmem:[%s1128_s6 + $0x70] sm:$0xff] %v979_v3   ;;  %v576_v15 = vadd.f32 %v575_v10, %v545_v9 }
  0xcf   : > { %v476_v12 = vpop.f32.mrf.mxu2  ;;  %v1192_v19 = vpop.f32.mrf.mxu3 }
  0xd0   : > { %v438_v13 = vpop.f32.mrf.mxu0  ;;  %v458_v14 = vpop.f32.mrf.mxu1 }
  0xd1   : > { %v507_v16 = vadd.f32 %v506_v11, %v438_v13  ;;  %v546_v17 = vmul.f32 %v438_v13, %v438_v13  ;;  %v924_v18 = vpack.c.bf16 %v438_v13, %v436_v60  ;;  %v944_v20 = vpack.c.bf16 %v458_v14, %v456_v61 }
  0xd2   : > { %v554_v62 = vmul.f32 %v458_v14, %v458_v14  ;;  %v560_v11 = vmul.f32 %v1182_v59, %v1182_v59 }
  0xd3   : > { %v508_v25 = vadd.f32 %v507_v16, %v1119_v21  ;;  %v577_v27 = vadd.f32 %v576_v15, %v546_v17  ;;  %988 = vst [vmem:[%s1128_s6 + $0x18] sm:$0xff] %v924_v18   ;;  %v550_v21 = vmul.f32 %v1152_v36, %v1152_v36  ;;  %v561_v15 = vmul.f32 %v476_v12, %v476_v12 }
  0xd4   : > { %992 = vst [vmem:[%s1128_s6 + $0x38] sm:$0xff] %v944_v20  }
  0xd5   : > { %v509_v31 = vadd.f32 %v508_v25, %v1130_v24  ;;  %v578_v33 = vadd.f32 %v577_v27, %v547_v23 }
  0xd7   : > { %v510_v37 = vadd.f32 %v509_v31, %v1140_v30  ;;  %v579_v39 = vadd.f32 %v578_v33, %v548_v29  ;;  %v478_v41 = vpop.f32.mrf.mxu2  ;;  %v498_v49 = vpop.f32.mrf.mxu3  ;;  %v552_v30 = vmul.f32 %v1174_v48, %v1174_v48  ;;  %v566_v31 = vmul.f32 %v1166_v44, %v1166_v44 }
  0xd8   : > { %v964_v43 = vpack.c.bf16 %v478_v41, %v476_v12  ;;  %v984_v24 = vpack.c.bf16 %v498_v49, %v1192_v19  ;;  %v562_v18 = vmul.f32 %v478_v41, %v478_v41 }
  0xd9   : > { %v580_v45 = vadd.f32 %v579_v39, %v549_v35  ;;  %v511_v47 = vadd.f32 %v510_v37, %v1152_v36  ;;  %v567_v35 = vmul.f32 %v1176_v50, %v1176_v50 }
  0xda   : > { %996 = vst [vmem:[%s1128_s6 + $0x58] sm:$0xff] %v964_v43  }
  0xdb   : > { %v512_v52 = vadd.f32 %v511_v47, %v1162_v42  ;;  %v581_v53 = vadd.f32 %v580_v45, %v550_v21  ;;  %1000 = vst [vmem:[%s1128_s6 + $0x78] sm:$0xff] %v984_v24   ;;  %v569_v45 = vmul.f32 %v1192_v19, %v1192_v19  ;;  %v570_v24 = vmul.f32 %v498_v49, %v498_v49 }
  0xdd   : > { %v513_v54 = vadd.f32 %v512_v52, %v1174_v48  ;;  %v582_v55 = vadd.f32 %v581_v53, %v551_v51  ;;  %v557_v48 = vmul.f32 %v1150_v34, %v1150_v34 }
  0xdf   : > { %v514_v56 = vadd.f32 %v513_v54, %v456_v61  ;;  %v583_v36 = vadd.f32 %v582_v55, %v552_v30 }
  0xe1   : > { %v584_v58 = vadd.f32 %v583_v36, %v553_v57  ;;  %v515_v60 = vadd.f32 %v514_v56, %v458_v14 }
  0xe3   : > { %v516_v0 = vadd.f32 %v515_v60, %v1121_v22  ;;  %v585_v42 = vadd.f32 %v584_v58, %v554_v62  ;;  %v559_v22 = vmul.f32 %v1172_v46, %v1172_v46 }
  0xe5   : > { %v517_v3 = vadd.f32 %v516_v0, %v1138_v28  ;;  %v586_v4 = vadd.f32 %v585_v42, %v555_v63 }
  0xe7   : > { %v518_v61 = vadd.f32 %v517_v3, %v1150_v34  ;;  %v587_v5 = vadd.f32 %v586_v4, %v556_v1 }
  0xe9   : > { %v588_v7 = vadd.f32 %v587_v5, %v557_v48  ;;  %v519_v8 = vadd.f32 %v518_v61, %v1160_v40  ;;  %v563_v40 = vmul.f32 %v1132_v26, %v1132_v26 }
  0xeb   : > { %v520_v9 = vadd.f32 %v519_v8, %v1172_v46  ;;  %v589_v10 = vadd.f32 %v588_v7, %v558_v6  ;;  %v564_v46 = vmul.f32 %v1144_v32, %v1144_v32 }
  0xed   : > { %v521_v28 = vadd.f32 %v520_v9, %v1182_v59  ;;  %v590_v13 = vadd.f32 %v589_v10, %v559_v22  ;;  %v565_v59 = vmul.f32 %v1154_v38, %v1154_v38 }
  0xef   : > { %v591_v34 = vadd.f32 %v590_v13, %v560_v11  ;;  %v522_v14 = vadd.f32 %v521_v28, %v476_v12 }
  0xf1   : > { %v592_v16 = vadd.f32 %v591_v34, %v561_v15  ;;  %v523_v17 = vadd.f32 %v522_v14, %v478_v41 }
  0xf3   : > { %v524_v20 = vadd.f32 %v523_v17, %v1132_v26  ;;  %v593_v23 = vadd.f32 %v592_v16, %v562_v18 }
  0xf5   : > { %v525_v25 = vadd.f32 %v524_v20, %v1144_v32  ;;  %v594_v27 = vadd.f32 %v593_v23, %v563_v40 }
  0xf7   : > { %v526_v12 = vadd.f32 %v525_v25, %v1154_v38  ;;  %v595_v29 = vadd.f32 %v594_v27, %v564_v46  ;;  %v568_v38 = vmul.f32 %v1186_v2, %v1186_v2 }
  0xf9   : > { %v596_v33 = vadd.f32 %v595_v29, %v565_v59  ;;  %v527_v26 = vadd.f32 %v526_v12, %v1166_v44 }
  0xfb   : > { %v528_v37 = vadd.f32 %v527_v26, %v1176_v50  ;;  %v597_v32 = vadd.f32 %v596_v33, %v566_v31 }
  0xfd   : > { %v529_v39 = vadd.f32 %v528_v37, %v1186_v2  ;;  %v598_v41 = vadd.f32 %v597_v32, %v567_v35 }
  0xff   : > { %v599_v43 = vadd.f32 %v598_v41, %v568_v38  ;;  %v530_v21 = vadd.f32 %v529_v39, %v1192_v19 }
 0x101   : > { %v600_v44 = vadd.f32 %v599_v43, %v569_v45  ;;  %v531_v47 = vadd.f32 %v530_v21, %v498_v49 }
 0x103   : > { %v532_v51 = vrot.slane %v531_v47, 4  ;;  %v601_v52 = vadd.f32 %v600_v44, %v570_v24 }
 0x105   : > { %v533_v50 = vadd.f32 %v532_v51, %v531_v47  ;;  %v602_v53 = vrot.slane %v601_v52, 4 }
 0x107   : > { %v534_v30 = vrot.slane %v533_v50, 2  ;;  %v603_v54 = vadd.f32 %v602_v53, %v601_v52 }
 0x109   : > { %v535_v55 = vadd.f32 %v534_v30, %v533_v50  ;;  %v604_v2 = vrot.slane %v603_v54, 2 }
 0x10b   : > { %v536_v56 = vrot.slane %v535_v55, 1  ;;  %v605_v57 = vadd.f32 %v604_v2, %v603_v54 }
 0x10d   : > { %v537_v19 = vadd.f32 %v536_v56, %v535_v55  ;;  %v606_v36 = vrot.slane %v605_v57, 1 }
 0x10f   : > { %538 = vst [vmem:[%s214_s9] sm:$0x1] %v537_v19  ;;  %v607_v49 = vadd.f32 %v606_v36, %v605_v57 }
 0x111   : > { %608 = vst [vmem:[%s217_s12] sm:$0x1] %v607_v49 }
 0x112 PF: > { %s15_s15 = sadd.s32 1, %s1027_s15  }
 0x113   : > { %p12_p5 = scmp.ge.s32.totalorder %s15_s15, 4  }
 0x115   :  { %14 = sbr.rel (!%p12_p5) target bundleno = 1 (0x1), region = 82 }

// kernel: discriminator_forward.6
= control target key start
LH: loop header
LB: loop body
LE: loop exit
PB: predicated region body
PF: predicated region fallthrough
CT: control target
= control target key end

     0   :  { %s660_s15 = smov 0   ;;  %s715_s0 = inlined_call_operand.vmem [shape: bf16[128,128], index: 0, kind: input, shape index: {}]   ;;  %s716_s1 = inlined_call_operand.vmem [shape: bf16[128,128], index: 1, kind: input, shape index: {}]   ;;  %s717_s2 = inlined_call_operand.vmem [shape: bf16[128,128], index: 2, kind: output, shape index: {0}]   ;;  %s718_s3 = inlined_call_operand.vmem [shape: f32[2,1,128], index: 3, kind: output, shape index: {1}]   ;;  %s719_s4 = inlined_call_operand.vmem [shape: f32[2,1,128], index: 4, kind: output, shape index: {2}]  }
   0x1 LB: > { %s666_s16 = sadd.s32 4294967295, %s633_s15   ;;  %p505_p0 = scmp.ge.s32.totalorder %s633_s15, 1  ;;  %s633_s15 = sphi %s660_s15, %s15_s15  }
   0x2   : > { %p168_p1 = scmp.lt.s32.totalorder %s633_s15, 3 }
   0x4   : > { %p169_p2 = pnand %p505_p0, %p168_p1 }
   0x5   : > { %s506_s25 = sshll.u32 (!%p169_p2), %s666_s16, 3  ;;  %p212_p4 = scmp.lt.s32.totalorder (!%p169_p2), %s666_s16, 1 }
   0x6   : > { %172 = sbr.rel (%p169_p2) target bundleno = 206 (0xce), region = 28  ;;  %p201_p3 = scmp.lt.s32.totalorder (!%p169_p2), %s506_s25, 15 }
   0xb   : > { %v571_v0 = vld [vmem:[%s716_s1 + $0x38] sm:$0xff]  ;;  %v570_v1 = vld [vmem:[%s716_s1 + $0x30] sm:$0xff]  ;;  %v569_v2 = vld [vmem:[%s716_s1 + $0x28] sm:$0xff]  ;;  %s721_s25 = smov (!%p201_p3, %s506_s25), 15  ;;  %s723_s16 = smov (!%p212_p4, %s666_s16), 1 }
   0xc   : > { %314 = vmatpush.bf16.msra.mxu0 %v571_v0  ;;  %595 = vmatpush.bf16.msra.mxu1 %v571_v0  ;;  %v568_v3 = vld [vmem:[%s716_s1 + $0x20] sm:$0xff]  ;;  %v567_v4 = vld [vmem:[%s716_s1 + $0x18] sm:$0xff]  ;;  %v566_v5 = vld [vmem:[%s716_s1 + $0x10] sm:$0xff]  ;;  %s507_s6 = sshll.u32 %s721_s25, 2  ;;  %s214_s19 = scalar_lea.vmem %s718_s3, %s723_s16 }
   0xd   : > { %596 = vmatpush.bf16.msra.mxu2 %v571_v0  ;;  %597 = vmatpush.bf16.msra.mxu3 %v571_v0  ;;  %v565_v6 = vld [vmem:[%s716_s1 + $0x8] sm:$0xff]  ;;  %v564_v7 = vld [vmem:[%s716_s1] sm:$0xff]  ;;  %s204_s11 = scalar_lea.vmem %s715_s0, %s507_s6  ;;  %s210_s14 = scalar_lea.vmem %s717_s2, %s507_s6 }
   0xe   : > { %v560_v8 = vld [vmem:[%s204_s11] sm:$0xff]  ;;  %v561_v9 = vld [vmem:[%s204_s11 + $0x8] sm:$0xff]  ;;  %v562_v10 = vld [vmem:[%s204_s11 + $0x10] sm:$0xff]  ;;  %s217_s22 = scalar_lea.vmem %s719_s4, %s723_s16 }
   0xf   : > { %v563_v11 = vld [vmem:[%s204_s11 + $0x18] sm:$0xff] }
  0x10   : > { %315 = vmatpush.bf16.msra.mxu0 %v570_v1  ;;  %598 = vmatpush.bf16.msra.mxu1 %v570_v1 }
  0x11   : > { %599 = vmatpush.bf16.msra.mxu2 %v570_v1  ;;  %600 = vmatpush.bf16.msra.mxu3 %v570_v1 }
  0x14   : > { %316 = vmatpush.bf16.msra.mxu0 %v569_v2  ;;  %601 = vmatpush.bf16.msra.mxu1 %v569_v2 }
  0x15   : > { %602 = vmatpush.bf16.msra.mxu2 %v569_v2  ;;  %603 = vmatpush.bf16.msra.mxu3 %v569_v2 }
  0x18   : > { %317 = vmatpush.bf16.msra.mxu0 %v568_v3  ;;  %604 = vmatpush.bf16.msra.mxu1 %v568_v3 }
  0x19   : > { %605 = vmatpush.bf16.msra.mxu2 %v568_v3  ;;  %606 = vmatpush.bf16.msra.mxu3 %v568_v3 }
  0x1c   : > { %318 = vmatpush.bf16.msra.mxu0 %v567_v4  ;;  %607 = vmatpush.bf16.msra.mxu1 %v567_v4 }
  0x1d   : > { %608 = vmatpush.bf16.msra.mxu2 %v567_v4  ;;  %609 = vmatpush.bf16.msra.mxu3 %v567_v4 }
  0x20   : > { %319 = vmatpush.bf16.msra.mxu0 %v566_v5  ;;  %610 = vmatpush.bf16.msra.mxu1 %v566_v5 }
  0x21   : > { %611 = vmatpush.bf16.msra.mxu2 %v566_v5  ;;  %612 = vmatpush.bf16.msra.mxu3 %v566_v5 }
  0x24   : > { %320 = vmatpush.bf16.msra.mxu0 %v565_v6  ;;  %613 = vmatpush.bf16.msra.mxu1 %v565_v6 }
  0x25   : > { %614 = vmatpush.bf16.msra.mxu2 %v565_v6  ;;  %615 = vmatpush.bf16.msra.mxu3 %v565_v6 }
  0x28   : > { %321 = vmatpush.bf16.msra.mxu0 %v564_v7  ;;  %616 = vmatpush.bf16.msra.mxu1 %v564_v7 }
  0x29   : > { %617 = vmatpush.bf16.msra.mxu2 %v564_v7  ;;  %618 = vmatpush.bf16.msra.mxu3 %v564_v7 }
  0x2b   : > { %322 = vmatmul.bf16.vlgmr.msra.gmra.mxu0 %v560_v8  ;;  %327 = vmatmul.bf16.vlgmr.msra.gmra.mxu1 %v561_v9 }
  0x2c   : > { %332 = vmatmul.bf16.vlgmr.msra.gmra.mxu2 %v562_v10  ;;  %337 = vmatmul.bf16.vlgmr.msra.gmra.mxu3 %v563_v11 }
  0xa8   : > { %v323_v12 = vpop.f32.mrf.mxu0  ;;  %v328_v13 = vpop.f32.mrf.mxu1 }
  0xa9   : > { %v357_v18 = vmul.f32 %v323_v12, %v323_v12  ;;  %v359_v23 = vmul.f32 %v328_v13, %v328_v13 }
  0xaf   : > { %v333_v14 = vpop.f32.mrf.mxu2  ;;  %v338_v15 = vpop.f32.mrf.mxu3 }
  0xb0   : > { %v325_v16 = vpop.f32.mrf.mxu0  ;;  %v330_v17 = vpop.f32.mrf.mxu1  ;;  %v361_v29 = vmul.f32 %v333_v14, %v333_v14  ;;  %v363_v39 = vmul.f32 %v338_v15, %v338_v15 }
  0xb1   : > { %v343_v19 = vadd.f32 %v325_v16, %v323_v12  ;;  %v358_v20 = vmul.f32 %v325_v16, %v325_v16  ;;  %v575_v21 = vpack.c.bf16 %v325_v16, %v323_v12  ;;  %v580_v22 = vpack.c.bf16 %v330_v17, %v328_v13 }
  0xb2   : > { %v360_v27 = vmul.f32 %v330_v17, %v330_v17 }
  0xb3   : > { %v365_v24 = vadd.f32 %v358_v20, %v357_v18  ;;  %576 = vst [vmem:[%s210_s14] sm:$0xff] %v575_v21   ;;  %v344_v25 = vadd.f32 %v343_v19, %v328_v13 }
  0xb4   : > { %592 = vst [vmem:[%s210_s14 + $0x8] sm:$0xff] %v580_v22  }
  0xb5   : > { %v345_v26 = vadd.f32 %v344_v25, %v330_v17  ;;  %v366_v28 = vadd.f32 %v365_v24, %v359_v23 }
  0xb7   : > { %v367_v30 = vadd.f32 %v366_v28, %v360_v27  ;;  %v335_v31 = vpop.f32.mrf.mxu2  ;;  %v346_v32 = vadd.f32 %v345_v26, %v333_v14  ;;  %v340_v33 = vpop.f32.mrf.mxu3 }
  0xb8   : > { %v585_v34 = vpack.c.bf16 %v335_v31, %v333_v14  ;;  %v590_v35 = vpack.c.bf16 %v340_v33, %v338_v15  ;;  %v362_v37 = vmul.f32 %v335_v31, %v335_v31  ;;  %v364_v43 = vmul.f32 %v340_v33, %v340_v33 }
  0xb9   : > { %v347_v36 = vadd.f32 %v346_v32, %v335_v31  ;;  %v368_v38 = vadd.f32 %v367_v30, %v361_v29 }
  0xba   : > { %593 = vst [vmem:[%s210_s14 + $0x10] sm:$0xff] %v585_v34  }
  0xbb   : > { %v369_v40 = vadd.f32 %v368_v38, %v362_v37  ;;  %v348_v41 = vadd.f32 %v347_v36, %v338_v15  ;;  %594 = vst [vmem:[%s210_s14 + $0x18] sm:$0xff] %v590_v35  }
  0xbd   : > { %v349_v42 = vadd.f32 %v348_v41, %v340_v33  ;;  %v370_v44 = vadd.f32 %v369_v40, %v363_v39 }
  0xbf   : > { %v350_v45 = vrot.slane %v349_v42, 4  ;;  %v371_v46 = vadd.f32 %v370_v44, %v364_v43 }
  0xc1   : > { %v351_v47 = vadd.f32 %v350_v45, %v349_v42  ;;  %v372_v48 = vrot.slane %v371_v46, 4 }
  0xc3   : > { %v352_v49 = vrot.slane %v351_v47, 2  ;;  %v373_v50 = vadd.f32 %v372_v48, %v371_v46 }
  0xc5   : > { %v353_v51 = vadd.f32 %v352_v49, %v351_v47  ;;  %v374_v52 = vrot.slane %v373_v50, 2 }
  0xc7   : > { %v354_v53 = vrot.slane %v353_v51, 1  ;;  %v375_v54 = vadd.f32 %v374_v52, %v373_v50 }
  0xc9   : > { %v355_v55 = vadd.f32 %v354_v53, %v353_v51  ;;  %v376_v56 = vrot.slane %v375_v54, 1 }
  0xcb   : > { %356 = vst [vmem:[%s214_s19] sm:$0x1] %v355_v55  ;;  %v377_v57 = vadd.f32 %v376_v56, %v375_v54 }
  0xcd   : > { %378 = vst [vmem:[%s217_s22] sm:$0x1] %v377_v57 }
  0xce PF: > { %s15_s15 = sadd.s32 1, %s633_s15  }
  0xcf   : > { %p12_p5 = scmp.ge.s32.totalorder %s15_s15, 4  }
  0xd1   :  { %14 = sbr.rel (!%p12_p5) target bundleno = 1 (0x1), region = 82 }

// kernel: discriminator_forward.7
= control target key start
LH: loop header
LB: loop body
LE: loop exit
PB: predicated region body
PF: predicated region fallthrough
CT: control target
= control target key end

     0   :  { %s666_s15 = smov 0   ;;  %s746_s0 = inlined_call_operand.vmem [shape: bf16[32,256], index: 0, kind: input, shape index: {}]   ;;  %s747_s1 = inlined_call_operand.vmem [shape: bf16[256,128], index: 1, kind: input, shape index: {}]   ;;  %s748_s2 = inlined_call_operand.vmem [shape: bf16[32,128], index: 2, kind: output, shape index: {0}]   ;;  %s749_s3 = inlined_call_operand.vmem [shape: f32[2,1,128], index: 3, kind: output, shape index: {1}]   ;;  %s750_s4 = inlined_call_operand.vmem [shape: f32[2,1,128], index: 4, kind: output, shape index: {2}]  }
   0x1 LB: > { %s672_s16 = sadd.s32 4294967295, %s639_s15   ;;  %p521_p0 = scmp.ge.s32.totalorder %s639_s15, 1  ;;  %s639_s15 = sphi %s666_s15, %s15_s15  }
   0x2   : > { %p169_p1 = scmp.lt.s32.totalorder %s639_s15, 3 }
   0x4   : > { %p170_p2 = pnand %p521_p0, %p169_p1 }
   0x5   : > { %s522_s29 = sshll.u32 (!%p170_p2), %s672_s16, 1  ;;  %p215_p4 = scmp.lt.s32.totalorder (!%p170_p2), %s672_s16, 1 }
   0x6   : > { %173 = sbr.rel (%p170_p2) target bundleno = 197 (0xc5), region = 28  ;;  %p203_p3 = scmp.lt.s32.totalorder (!%p170_p2), %s522_s29, 3 }
   0xb   : > { %v611_v0 = vld [vmem:[%s747_s1 + $0x38] sm:$0xff]  ;;  %v610_v2 = vld [vmem:[%s747_s1 + $0x30] sm:$0xff]  ;;  %v609_v4 = vld [vmem:[%s747_s1 + $0x28] sm:$0xff]  ;;  %s752_s29 = smov (!%p203_p3, %s522_s29), 3  ;;  %s754_s16 = smov (!%p215_p4, %s672_s16), 1 }
   0xc   : > { %v619_v1 = vld [vmem:[%s747_s1 + $0x78] sm:$0xff]  ;;  %361 = vmatpush.bf16.msra.mxu0 %v611_v0  ;;  %v618_v3 = vld [vmem:[%s747_s1 + $0x70] sm:$0xff]  ;;  %v617_v5 = vld [vmem:[%s747_s1 + $0x68] sm:$0xff]  ;;  %s601_s18 = sshll.u32 %s752_s29, 3  ;;  %s526_s5 = sshll.u32 %s752_s29, 2 }
   0xd   : > { %375 = vmatpush.bf16.msra.mxu1 %v619_v1  ;;  %v608_v6 = vld [vmem:[%s747_s1 + $0x20] sm:$0xff]  ;;  %v607_v8 = vld [vmem:[%s747_s1 + $0x18] sm:$0xff]  ;;  %v606_v10 = vld [vmem:[%s747_s1 + $0x10] sm:$0xff]  ;;  %s207_s25 = scalar_lea.vmem %s746_s0, %s601_s18  ;;  %s213_s8 = scalar_lea.vmem %s748_s2, %s526_s5 }
   0xe   : > { %v616_v7 = vld [vmem:[%s747_s1 + $0x60] sm:$0xff]  ;;  %v615_v9 = vld [vmem:[%s747_s1 + $0x58] sm:$0xff]  ;;  %v614_v11 = vld [vmem:[%s747_s1 + $0x50] sm:$0xff]  ;;  %s217_s10 = scalar_lea.vmem %s749_s3, %s754_s16  ;;  %s220_s13 = scalar_lea.vmem %s750_s4, %s754_s16 }
   0xf   : > { %v605_v12 = vld [vmem:[%s747_s1 + $0x8] sm:$0xff]  ;;  %v604_v14 = vld [vmem:[%s747_s1] sm:$0xff] }
  0x10   : > { %362 = vmatpush.bf16.msra.mxu0 %v610_v2  ;;  %v613_v13 = vld [vmem:[%s747_s1 + $0x48] sm:$0xff]  ;;  %v612_v15 = vld [vmem:[%s747_s1 + $0x40] sm:$0xff] }
  0x11   : > { %376 = vmatpush.bf16.msra.mxu1 %v618_v3  ;;  %v529_v16 = vld [vmem:[%s207_s25] sm:$0xf]  ;;  %v603_v17 = vld [vmem:[%s207_s25 + $0x4] sm:$0xf0]  ;;  %v602_v18 = vld [vmem:[%s207_s25 + $0x4] sm:$0xf] }
  0x12   : > { %v531_v19 = vld [vmem:[%s207_s25 + $0x8] sm:$0xf0]  ;;  %v530_v20 = vor.u32 %v603_v17, %v529_v16 }
  0x13   : > { %v534_v21 = vor.u32 %v602_v18, %v531_v19 }
  0x14   : > { %363 = vmatpush.bf16.msra.mxu0 %v609_v4 }
  0x15   : > { %377 = vmatpush.bf16.msra.mxu1 %v617_v5 }
  0x18   : > { %364 = vmatpush.bf16.msra.mxu0 %v608_v6 }
  0x19   : > { %378 = vmatpush.bf16.msra.mxu1 %v616_v7 }
  0x1c   : > { %365 = vmatpush.bf16.msra.mxu0 %v607_v8 }
  0x1d   : > { %379 = vmatpush.bf16.msra.mxu1 %v615_v9 }
  0x20   : > { %366 = vmatpush.bf16.msra.mxu0 %v606_v10 }
  0x21   : > { %380 = vmatpush.bf16.msra.mxu1 %v614_v11 }
  0x24   : > { %367 = vmatpush.bf16.msra.mxu0 %v605_v12 }
  0x25   : > { %381 = vmatpush.bf16.msra.mxu1 %v613_v13 }
  0x28   : > { %368 = vmatpush.bf16.msra.mxu0 %v604_v14 }
  0x29   : > { %382 = vmatpush.bf16.msra.mxu1 %v612_v15 }
  0x2b   : > { %369 = vmatmul.bf16.vlgmr.msra.gmra.mxu0 %v530_v20 }
  0x2c   : > { %383 = vmatmul.bf16.vlgmr.msra.gmra.mxu1 %v534_v21 }
  0xa8   : > { %v370_v22 = vpop.f32.mrf.mxu0 }
  0xa9   : > { %v384_v23 = vpop.f32.mrf.mxu1 }
  0xaa   : > { %v385_v24 = vadd.f32 %v384_v23, %v370_v22 }
  0xac   : > { %v397_v28 = vmul.f32 %v385_v24, %v385_v24 }
  0xb0   : > { %v372_v25 = vpop.f32.mrf.mxu0 }
  0xb1   : > { %v386_v26 = vpop.f32.mrf.mxu1 }
  0xb2   : > { %v387_v27 = vadd.f32 %v386_v26, %v372_v25 }
  0xb4   : > { %v389_v29 = vadd.f32 %v387_v27, %v385_v24  ;;  %v398_v30 = vmul.f32 %v387_v27, %v387_v27  ;;  %v623_v31 = vpack.c.bf16 %v387_v27, %v385_v24 }
  0xb6   : > { %v390_v32 = vrot.slane %v389_v29, 4  ;;  %v399_v33 = vadd.f32 %v398_v30, %v397_v28  ;;  %624 = vst [vmem:[%s213_s8] sm:$0xff] %v623_v31  }
  0xb8   : > { %v391_v34 = vadd.f32 %v390_v32, %v389_v29  ;;  %v400_v35 = vrot.slane %v399_v33, 4 }
  0xba   : > { %v392_v36 = vrot.slane %v391_v34, 2  ;;  %v401_v37 = vadd.f32 %v400_v35, %v399_v33 }
  0xbc   : > { %v393_v38 = vadd.f32 %v392_v36, %v391_v34  ;;  %v402_v39 = vrot.slane %v401_v37, 2 }
  0xbe   : > { %v394_v40 = vrot.slane %v393_v38, 1  ;;  %v403_v41 = vadd.f32 %v402_v39, %v401_v37 }
  0xc0   : > { %v395_v42 = vadd.f32 %v394_v40, %v393_v38  ;;  %v404_v43 = vrot.slane %v403_v41, 1 }
  0xc2   : > { %396 = vst [vmem:[%s217_s10] sm:$0x1] %v395_v42  ;;  %v405_v44 = vadd.f32 %v404_v43, %v403_v41 }
  0xc4   : > { %406 = vst [vmem:[%s220_s13] sm:$0x1] %v405_v44 }
  0xc5 PF: > { %s15_s15 = sadd.s32 1, %s639_s15  }
  0xc6   : > { %p12_p5 = scmp.ge.s32.totalorder %s15_s15, 4  }
  0xc8   :  { %14 = sbr.rel (!%p12_p5) target bundleno = 1 (0x1), region = 82 }

</bundles_post_ra>
